<compile_context>
chip_gen: v6e
topology: v6e:2x2x1
jax: 0.10.0
libtpu: 0.0.40
codegen_flags: <defaults>
</compile_context>

<pallas_src>
import jax
import jax.numpy as jnp
import numpy as np
from jax.experimental import pallas as pl
from jax.experimental.pallas import tpu as pltpu

# ----------------------------- model config (small, TPU-friendly) ------------
VOCAB_SIZE = 64
EMB_DIM = 32
HID_DIM = 32
NUM_LAYERS = 2
BATCH = 2
SEQ = 8
DROPOUT_RATE = 0.65   # inference: dropout is identity
V_PAD = 128           # fc output padded to a full 128-lane group (== 4*HID_DIM)


# ----------------------------- Pallas kernel ---------------------------------
def _lstm_lm_kernel(
    ids_ref,      # (T*B, 1)   int32 token ids, time-major (row = t*B + b)
    w_ref,        # (V+4H, 4H) bf16 packed weights:
                  #   [0:V)        w_emb_ih0 = emb @ W_ih0^T     (V, 4H)
                  #   [V:V+H)      W_hh0^T                        (H, 4H)
                  #   [V+H:V+2H)   W_ih1^T                        (H, 4H)
                  #   [V+2H:V+3H)  W_hh1^T                        (H, 4H)
                  #   [V+3H:V+4H)  W_fc^T (lane-padded to V_PAD)  (H, Vp)
    b_ref,        # (3, 4H)    f32 packed biases: [b0; b1; bfc_pad]
    st_ref,       # (4B, H)    f32 packed initial state: [h0_l0; h0_l1; c0_l0; c0_l1]
    pred_ref,     # (T*B, Vp)  f32 logits, time-major, lane-dense (output)
    st_out_ref,   # (4B, H)    f32 packed final state (output)
    h_scr,        # (T*B, H)   f32 VMEM scratch: layer-1 hidden per step
):
    H = HID_DIM
    B = BATCH
    T = SEQ
    V = VOCAB_SIZE
    TB = T * B

    # ---- static views into the packed weight / bias slabs (hoisted) ----
    w_emb_ih0 = w_ref[0:V, :]                     # (V, 4H)  bf16
    whh0      = w_ref[V:V + H, :]                 # (H, 4H)  bf16
    w_ih1     = w_ref[V + H:V + 2 * H, :]         # (H, 4H)  bf16
    w_hh1     = w_ref[V + 2 * H:V + 3 * H, :]     # (H, 4H)  bf16
    wfc       = w_ref[V + 3 * H:V + 4 * H, :]     # (H, Vp)  bf16

    b0  = b_ref[0:1, :]                           # (1, 4H)  f32
    b1  = b_ref[1:2, :]                           # (1, 4H)  f32
    bfc = b_ref[2:3, :]                           # (1, Vp)  f32

    # ---- embedding gather fused with layer-0 input projection (one MXU push) ----
    ids = ids_ref[...]                                              # (TB, 1) int32
    iota_v = jax.lax.broadcasted_iota(jnp.int32, (TB, V), 1)
    one_hot = (iota_v == ids).astype(jnp.bfloat16)                  # (TB, V)
    xg0 = jnp.dot(one_hot, w_emb_ih0,
                  preferred_element_type=jnp.float32) + b0          # (TB, 4H) f32

    # ---- gate-lane mask for full-width activation + select (hoisted) ----
    lane = jax.lax.broadcasted_iota(jnp.int32, (B, 4 * H), 1)
    g_mask = (lane >= 2 * H) & (lane < 3 * H)                       # True on g-lanes

    def gates_to_hc(gates, c_prev):
        # PyTorch gate ordering: input | forget | cell(g) | output.
        # One full-width sigmoid + one full-width tanh (2 EUP pushes), then select.
        sig = jax.nn.sigmoid(gates)
        tnh = jnp.tanh(gates)
        acts = jnp.where(g_mask, tnh, sig)
        i = acts[:, 0 * H:1 * H]
        f = acts[:, 1 * H:2 * H]
        g = acts[:, 2 * H:3 * H]
        o = acts[:, 3 * H:4 * H]
        c_new = f * c_prev + i * g
        h_new = o * jnp.tanh(c_new)
        return h_new, c_new

    # packed state: [h layer0; h layer1; c layer0; c layer1]
    h0 = st_ref[0 * B:1 * B, :]
    h1 = st_ref[1 * B:2 * B, :]
    c0 = st_ref[2 * B:3 * B, :]
    c1 = st_ref[3 * B:4 * B, :]

    # TODO(synk): training-mode inter-layer LSTM dropout / output dropout are
    # identity in eval mode; dropout masks are not implemented here.

    for t in range(T):  # fully unrolled, static trip count
        # layer-1 hidden contribution from h1(t-1), b1 folded once; issued early
        # so its MXU push hides under layer-0's gate math.
        xg1_part = jnp.dot(h1.astype(jnp.bfloat16), w_hh1,
                           preferred_element_type=jnp.float32) + b1

        # layer 0: input contribution precomputed, only the recurrent dot in-loop
        g0 = xg0[t * B:(t + 1) * B, :] + jnp.dot(
            h0.astype(jnp.bfloat16), whh0, preferred_element_type=jnp.float32)
        h0, c0 = gates_to_hc(g0, c0)

        # layer 1: split accumulating dot (no lane-dim concat)
        g1 = xg1_part + jnp.dot(h0.astype(jnp.bfloat16), w_ih1,
                                preferred_element_type=jnp.float32)
        h1, c1 = gates_to_hc(g1, c1)

        # stash h1(t) for the hoisted fc matmul (store is off the dep chain)
        h_scr[t * B:(t + 1) * B, :] = h1

    # ---- final states, packed like the input ----
    st_out_ref[0 * B:1 * B, :] = h0
    st_out_ref[1 * B:2 * B, :] = h1
    st_out_ref[2 * B:3 * B, :] = c0
    st_out_ref[3 * B:4 * B, :] = c1

    # ---- fc hoisted out of the recurrence: one matmul, lane-dense store ----
    pred_ref[...] = (
        jnp.dot(h_scr[...].astype(jnp.bfloat16), wfc,
                preferred_element_type=jnp.float32) + bfc
    ).astype(pred_ref.dtype)


# ----------------------------- wrapper ----------------------------------------
@jax.jit
def lstm_lm_forward(src, h0, c0, params):
    """Equivalent of LSTMLanguageModel.forward(src, hidden) in eval mode.

    src: (B, T) int32 token ids
    h0, c0: (num_layers, B, H) float32
    returns: prediction (B, T, V), (hN, cN)
    """
    B, T = src.shape
    H, V = HID_DIM, VOCAB_SIZE

    # time-major token ids: row index = t*B + b
    src_tm = jnp.transpose(src).reshape(T * B, 1).astype(jnp.int32)

    # ---- packed bf16 weight slab (all pieces are exactly 128 lanes wide) ----
    w_emb_ih0 = params["embedding"] @ params["w_ih0"].T             # (V, 4H)
    wfc_pad = jnp.zeros((H, V_PAD), jnp.float32).at[:, :V].set(params["w_fc"].T)
    w_slab = jnp.concatenate(
        [w_emb_ih0,                # rows [0, V)
         params["w_hh0"].T,        # rows [V, V+H)
         params["w_ih1"].T,        # rows [V+H, V+2H)
         params["w_hh1"].T,        # rows [V+2H, V+3H)
         wfc_pad],                 # rows [V+3H, V+4H)
        axis=0).astype(jnp.bfloat16)                                # (V+4H, 128)

    # ---- packed f32 bias slab ----
    b0 = (params["b_ih0"] + params["b_hh0"]).reshape(1, 4 * H)
    b1 = (params["b_ih1"] + params["b_hh1"]).reshape(1, 4 * H)
    bfc = jnp.zeros((1, V_PAD), jnp.float32).at[:, :V].set(params["b_fc"].reshape(1, V))
    b_slab = jnp.concatenate([b0, b1, bfc], axis=0)                 # (3, 128)

    # ---- packed initial state: [h_l0; h_l1; c_l0; c_l1] ----
    st = jnp.concatenate([h0[0], h0[1], c0[0], c0[1]], axis=0)      # (4B, H)

    vmem_spec = pl.BlockSpec(memory_space=pltpu.MemorySpace.VMEM)

    pred_pad, st_out = pl.pallas_call(
        _lstm_lm_kernel,
        out_shape=(
            jax.ShapeDtypeStruct((T * B, V_PAD), jnp.float32),
            jax.ShapeDtypeStruct((2 * NUM_LAYERS * B, H), jnp.float32),
        ),
        in_specs=[vmem_spec, vmem_spec, vmem_spec, vmem_spec],
        out_specs=(vmem_spec, vmem_spec),
        scratch_shapes=[pltpu.VMEM((T * B, H), jnp.float32)],
    )(src_tm, w_slab, b_slab, st)

    # strip lane padding, back to batch_first (B, T, V); unpack states
    pred = jnp.transpose(pred_pad[:, :V].reshape(T, B, V), (1, 0, 2))
    hN = jnp.stack([st_out[0 * B:1 * B], st_out[1 * B:2 * B]])
    cN = jnp.stack([st_out[2 * B:3 * B], st_out[3 * B:4 * B]])
    return pred, (hN, cN)


# ----------------------------- pure-JAX reference (for verification) ----------
def ref_forward(src, h0, c0, p):
    x = p["embedding"][src]  # (B, T, E)
    h_l = [h0[0], h0[1]]
    c_l = [c0[0], c0[1]]
    outs = []
    for t in range(x.shape[1]):
        inp = x[:, t]
        for l in range(NUM_LAYERS):
            wih, whh = p[f"w_ih{l}"], p[f"w_hh{l}"]
            bih, bhh = p[f"b_ih{l}"], p[f"b_hh{l}"]
            gates = inp @ wih.T + bih + h_l[l] @ whh.T + bhh
            i, f, g, o = jnp.split(gates, 4, axis=-1)
            i, f, g, o = jax.nn.sigmoid(i), jax.nn.sigmoid(f), jnp.tanh(g), jax.nn.sigmoid(o)
            c_l[l] = f * c_l[l] + i * g
            h_l[l] = o * jnp.tanh(c_l[l])
            inp = h_l[l]
        outs.append(inp)
    out = jnp.stack(outs, axis=1)                 # (B, T, H)
    pred = out @ p["w_fc"].T + p["b_fc"]          # (B, T, V)
    return pred, (jnp.stack(h_l), jnp.stack(c_l))


# ----------------------------- deterministic params ---------------------------
def init_params(key):
    keys = jax.random.split(key, 12)
    k = 1.0 / np.sqrt(HID_DIM)
    p = {
        "embedding": jax.random.normal(keys[0], (VOCAB_SIZE, EMB_DIM), jnp.float32) * 0.1,
        # layer 0
        "w_ih0": jax.random.uniform(keys[1], (4 * HID_DIM, EMB_DIM), jnp.float32, -k, k),
        "w_hh0": jax.random.uniform(keys[2], (4 * HID_DIM, HID_DIM), jnp.float32, -k, k),
        "b_ih0": jax.random.uniform(keys[3], (4 * HID_DIM,), jnp.float32, -k, k),
        "b_hh0": jax.random.uniform(keys[4], (4 * HID_DIM,), jnp.float32, -k, k),
        # layer 1
        "w_ih1": jax.random.uniform(keys[5], (4 * HID_DIM, HID_DIM), jnp.float32, -k, k),
        "w_hh1": jax.random.uniform(keys[6], (4 * HID_DIM, HID_DIM), jnp.float32, -k, k),
        "b_ih1": jax.random.uniform(keys[7], (4 * HID_DIM,), jnp.float32, -k, k),
        "b_hh1": jax.random.uniform(keys[8], (4 * HID_DIM,), jnp.float32, -k, k),
        # fc
        "w_fc": jax.random.uniform(keys[9], (VOCAB_SIZE, HID_DIM), jnp.float32, -k, k),
        "b_fc": jax.random.uniform(keys[10], (VOCAB_SIZE,), jnp.float32, -k, k),
    }
    return p


if __name__ == "__main__":
    key = jax.random.PRNGKey(0)
    pkey, skey, hkey, ckey = jax.random.split(key, 4)
    params = init_params(pkey)

    src = jax.random.randint(skey, (BATCH, SEQ), 0, VOCAB_SIZE, dtype=jnp.int32)
    # init_hidden() gives zeros; use small random states to exercise the state path
    h0 = jax.random.normal(hkey, (NUM_LAYERS, BATCH, HID_DIM), jnp.float32) * 0.1
    c0 = jax.random.normal(ckey, (NUM_LAYERS, BATCH, HID_DIM), jnp.float32) * 0.1

    pred, (hN, cN) = lstm_lm_forward(src, h0, c0, params)
    pred = jax.block_until_ready(pred)
    hN = jax.block_until_ready(hN)
    cN = jax.block_until_ready(cN)

    # sanity-check against pure-JAX f32 reference (kernel uses bf16 MXU operands
    # with f32 accumulation -> slightly looser tolerance than pure f32)
    pred_ref, (hN_ref, cN_ref) = ref_forward(src, h0, c0, params)
    assert pred.shape == (BATCH, SEQ, VOCAB_SIZE)
    assert hN.shape == (NUM_LAYERS, BATCH, HID_DIM)
    np.testing.assert_allclose(np.asarray(pred), np.asarray(pred_ref), atol=2e-2, rtol=2e-2)
    np.testing.assert_allclose(np.asarray(hN), np.asarray(hN_ref), atol=2e-2, rtol=2e-2)
    np.testing.assert_allclose(np.asarray(cN), np.asarray(cN_ref), atol=2e-2, rtol=2e-2)

    print("KERNEL_OK")
</pallas_src>

<mosaic_0001>
module attributes {stable_mosaic.version = 11 : i64} {
  func.func @_lstm_lm_kernel(%arg0: memref<16x1xi32, #tpu.memory_space<vmem>>, %arg1: memref<192x128xbf16, #tpu.memory_space<vmem>>, %arg2: memref<3x128xf32, #tpu.memory_space<vmem>>, %arg3: memref<8x32xf32, #tpu.memory_space<vmem>>, %arg4: memref<16x128xf32, #tpu.memory_space<vmem>>, %arg5: memref<8x32xf32, #tpu.memory_space<vmem>>, %arg6: memref<16x32xf32, #tpu.memory_space<vmem>>) attributes {dimension_semantics = [], scalar_prefetch = 0 : i64, scratch_operands = 1 : i64, tpu.core_type = #tpu.core_type<tc>} {
    %c0 = arith.constant 0 : index
    %c0_0 = arith.constant 0 : index
    %0 = vector.load %arg1[%c0, %c0_0] : memref<192x128xbf16, #tpu.memory_space<vmem>>, vector<64x128xbf16>
    %c64 = arith.constant 64 : index
    %c0_1 = arith.constant 0 : index
    %1 = vector.load %arg1[%c64, %c0_1] : memref<192x128xbf16, #tpu.memory_space<vmem>>, vector<32x128xbf16>
    %c96 = arith.constant 96 : index
    %c0_2 = arith.constant 0 : index
    %2 = vector.load %arg1[%c96, %c0_2] : memref<192x128xbf16, #tpu.memory_space<vmem>>, vector<32x128xbf16>
    %c128 = arith.constant 128 : index
    %c0_3 = arith.constant 0 : index
    %3 = vector.load %arg1[%c128, %c0_3] : memref<192x128xbf16, #tpu.memory_space<vmem>>, vector<32x128xbf16>
    %c160 = arith.constant 160 : index
    %c0_4 = arith.constant 0 : index
    %4 = vector.load %arg1[%c160, %c0_4] : memref<192x128xbf16, #tpu.memory_space<vmem>>, vector<32x128xbf16>
    %c0_5 = arith.constant 0 : index
    %c0_6 = arith.constant 0 : index
    %5 = vector.load %arg2[%c0_5, %c0_6] : memref<3x128xf32, #tpu.memory_space<vmem>>, vector<1x128xf32>
    %c1 = arith.constant 1 : index
    %c0_7 = arith.constant 0 : index
    %6 = vector.load %arg2[%c1, %c0_7] : memref<3x128xf32, #tpu.memory_space<vmem>>, vector<1x128xf32>
    %c2 = arith.constant 2 : index
    %c0_8 = arith.constant 0 : index
    %7 = vector.load %arg2[%c2, %c0_8] : memref<3x128xf32, #tpu.memory_space<vmem>>, vector<1x128xf32>
    %c0_9 = arith.constant 0 : index
    %c0_10 = arith.constant 0 : index
    %8 = vector.load %arg0[%c0_9, %c0_10] : memref<16x1xi32, #tpu.memory_space<vmem>>, vector<16x1xi32>
    %9 = tpu.iota {dimensions = array<i32: 1>} : vector<16x64xi32>
    %10 = vector.broadcast %8 : vector<16x1xi32> to vector<16x64xi32>
    %11 = arith.cmpi eq, %9, %10 : vector<16x64xi32>
    %12 = arith.extui %11 : vector<16x64xi1> to vector<16x64xi32>
    %13 = arith.sitofp %12 : vector<16x64xi32> to vector<16x64xf32>
    %14 = arith.truncf %13 : vector<16x64xf32> to vector<16x64xbf16>
    %cst = arith.constant dense<0.000000e+00> : vector<16x128xf32>
    %15 = tpu.matmul %14, %0, %cst {dimension_numbers = #tpu.dot_dimension_numbers<[1], [0], [0], [1], [0, 0, 1, 1], [], []>} : vector<16x64xbf16>, vector<64x128xbf16>, vector<16x128xf32> -> vector<16x128xf32>
    %16 = vector.broadcast %5 : vector<1x128xf32> to vector<16x128xf32>
    %17 = arith.addf %15, %16 : vector<16x128xf32>
    %18 = tpu.iota {dimensions = array<i32: 1>} : vector<2x128xi32>
    %c64_i32 = arith.constant 64 : i32
    %19 = vector.broadcast %c64_i32 : i32 to vector<2x128xi32>
    %20 = arith.cmpi sge, %18, %19 : vector<2x128xi32>
    %c96_i32 = arith.constant 96 : i32
    %21 = vector.broadcast %c96_i32 : i32 to vector<2x128xi32>
    %22 = arith.cmpi slt, %18, %21 : vector<2x128xi32>
    %23 = arith.andi %20, %22 : vector<2x128xi1>
    %c0_11 = arith.constant 0 : index
    %c0_12 = arith.constant 0 : index
    %24 = vector.load %arg3[%c0_11, %c0_12] : memref<8x32xf32, #tpu.memory_space<vmem>>, vector<2x32xf32>
    %c2_13 = arith.constant 2 : index
    %c0_14 = arith.constant 0 : index
    %25 = vector.load %arg3[%c2_13, %c0_14] : memref<8x32xf32, #tpu.memory_space<vmem>>, vector<2x32xf32>
    %c4 = arith.constant 4 : index
    %c0_15 = arith.constant 0 : index
    %26 = vector.load %arg3[%c4, %c0_15] : memref<8x32xf32, #tpu.memory_space<vmem>>, vector<2x32xf32>
    %c6 = arith.constant 6 : index
    %c0_16 = arith.constant 0 : index
    %27 = vector.load %arg3[%c6, %c0_16] : memref<8x32xf32, #tpu.memory_space<vmem>>, vector<2x32xf32>
    %28 = arith.truncf %25 : vector<2x32xf32> to vector<2x32xbf16>
    %cst_17 = arith.constant dense<0.000000e+00> : vector<2x128xf32>
    %29 = tpu.matmul %28, %3, %cst_17 {dimension_numbers = #tpu.dot_dimension_numbers<[1], [0], [0], [1], [0, 0, 1, 1], [], []>} : vector<2x32xbf16>, vector<32x128xbf16>, vector<2x128xf32> -> vector<2x128xf32>
    %30 = vector.broadcast %6 : vector<1x128xf32> to vector<2x128xf32>
    %31 = arith.addf %29, %30 : vector<2x128xf32>
    %32 = vector.extract_strided_slice %17 {offsets = [0, 0], sizes = [2, 128], strides = [1, 1]} : vector<16x128xf32> to vector<2x128xf32>
    %33 = arith.truncf %24 : vector<2x32xf32> to vector<2x32xbf16>
    %cst_18 = arith.constant dense<0.000000e+00> : vector<2x128xf32>
    %34 = tpu.matmul %33, %1, %cst_18 {dimension_numbers = #tpu.dot_dimension_numbers<[1], [0], [0], [1], [0, 0, 1, 1], [], []>} : vector<2x32xbf16>, vector<32x128xbf16>, vector<2x128xf32> -> vector<2x128xf32>
    %35 = arith.addf %32, %34 : vector<2x128xf32>
    %36 = arith.negf %35 : vector<2x128xf32>
    %37 = math.exp %36 : vector<2x128xf32>
    %cst_19 = arith.constant 1.000000e+00 : f32
    %38 = vector.broadcast %cst_19 : f32 to vector<2x128xf32>
    %39 = arith.addf %38, %37 : vector<2x128xf32>
    %40 = arith.divf %38, %39 : vector<2x128xf32>
    %41 = math.tanh %35 : vector<2x128xf32>
    %42 = arith.select %23, %41, %40 : vector<2x128xi1>, vector<2x128xf32>
    %43 = vector.extract_strided_slice %42 {offsets = [0, 0], sizes = [2, 32], strides = [1, 1]} : vector<2x128xf32> to vector<2x32xf32>
    %44 = vector.extract_strided_slice %42 {offsets = [0, 32], sizes = [2, 32], strides = [1, 1]} : vector<2x128xf32> to vector<2x32xf32>
    %45 = vector.extract_strided_slice %42 {offsets = [0, 64], sizes = [2, 32], strides = [1, 1]} : vector<2x128xf32> to vector<2x32xf32>
    %46 = vector.extract_strided_slice %42 {offsets = [0, 96], sizes = [2, 32], strides = [1, 1]} : vector<2x128xf32> to vector<2x32xf32>
    %47 = arith.mulf %44, %26 : vector<2x32xf32>
    %48 = arith.mulf %43, %45 : vector<2x32xf32>
    %49 = arith.addf %47, %48 : vector<2x32xf32>
    %50 = math.tanh %49 : vector<2x32xf32>
    %51 = arith.mulf %46, %50 : vector<2x32xf32>
    %52 = arith.truncf %51 : vector<2x32xf32> to vector<2x32xbf16>
    %cst_20 = arith.constant dense<0.000000e+00> : vector<2x128xf32>
    %53 = tpu.matmul %52, %2, %cst_20 {dimension_numbers = #tpu.dot_dimension_numbers<[1], [0], [0], [1], [0, 0, 1, 1], [], []>} : vector<2x32xbf16>, vector<32x128xbf16>, vector<2x128xf32> -> vector<2x128xf32>
    %54 = arith.addf %31, %53 : vector<2x128xf32>
    %55 = arith.negf %54 : vector<2x128xf32>
    %56 = math.exp %55 : vector<2x128xf32>
    %cst_21 = arith.constant 1.000000e+00 : f32
    %57 = vector.broadcast %cst_21 : f32 to vector<2x128xf32>
    %58 = arith.addf %57, %56 : vector<2x128xf32>
    %59 = arith.divf %57, %58 : vector<2x128xf32>
    %60 = math.tanh %54 : vector<2x128xf32>
    %61 = arith.select %23, %60, %59 : vector<2x128xi1>, vector<2x128xf32>
    %62 = vector.extract_strided_slice %61 {offsets = [0, 0], sizes = [2, 32], strides = [1, 1]} : vector<2x128xf32> to vector<2x32xf32>
    %63 = vector.extract_strided_slice %61 {offsets = [0, 32], sizes = [2, 32], strides = [1, 1]} : vector<2x128xf32> to vector<2x32xf32>
    %64 = vector.extract_strided_slice %61 {offsets = [0, 64], sizes = [2, 32], strides = [1, 1]} : vector<2x128xf32> to vector<2x32xf32>
    %65 = vector.extract_strided_slice %61 {offsets = [0, 96], sizes = [2, 32], strides = [1, 1]} : vector<2x128xf32> to vector<2x32xf32>
    %66 = arith.mulf %63, %27 : vector<2x32xf32>
    %67 = arith.mulf %62, %64 : vector<2x32xf32>
    %68 = arith.addf %66, %67 : vector<2x32xf32>
    %69 = math.tanh %68 : vector<2x32xf32>
    %70 = arith.mulf %65, %69 : vector<2x32xf32>
    %c0_22 = arith.constant 0 : index
    %c0_23 = arith.constant 0 : index
    %71 = vector.load %arg6[%c0_22, %c0_23] : memref<16x32xf32, #tpu.memory_space<vmem>>, vector<2x32xf32>
    tpu.vector_store %arg6[%c0_22, %c0_23], %70 {strides = array<i32>} : memref<16x32xf32, #tpu.memory_space<vmem>>, vector<2x32xf32>,
    %72 = arith.truncf %70 : vector<2x32xf32> to vector<2x32xbf16>
    %cst_24 = arith.constant dense<0.000000e+00> : vector<2x128xf32>
    %73 = tpu.matmul %72, %3, %cst_24 {dimension_numbers = #tpu.dot_dimension_numbers<[1], [0], [0], [1], [0, 0, 1, 1], [], []>} : vector<2x32xbf16>, vector<32x128xbf16>, vector<2x128xf32> -> vector<2x128xf32>
    %74 = vector.broadcast %6 : vector<1x128xf32> to vector<2x128xf32>
    %75 = arith.addf %73, %74 : vector<2x128xf32>
    %76 = vector.extract_strided_slice %17 {offsets = [2, 0], sizes = [2, 128], strides = [1, 1]} : vector<16x128xf32> to vector<2x128xf32>
    %77 = arith.truncf %51 : vector<2x32xf32> to vector<2x32xbf16>
    %cst_25 = arith.constant dense<0.000000e+00> : vector<2x128xf32>
    %78 = tpu.matmul %77, %1, %cst_25 {dimension_numbers = #tpu.dot_dimension_numbers<[1], [0], [0], [1], [0, 0, 1, 1], [], []>} : vector<2x32xbf16>, vector<32x128xbf16>, vector<2x128xf32> -> vector<2x128xf32>
    %79 = arith.addf %76, %78 : vector<2x128xf32>
    %80 = arith.negf %79 : vector<2x128xf32>
    %81 = math.exp %80 : vector<2x128xf32>
    %cst_26 = arith.constant 1.000000e+00 : f32
    %82 = vector.broadcast %cst_26 : f32 to vector<2x128xf32>
    %83 = arith.addf %82, %81 : vector<2x128xf32>
    %84 = arith.divf %82, %83 : vector<2x128xf32>
    %85 = math.tanh %79 : vector<2x128xf32>
    %86 = arith.select %23, %85, %84 : vector<2x128xi1>, vector<2x128xf32>
    %87 = vector.extract_strided_slice %86 {offsets = [0, 0], sizes = [2, 32], strides = [1, 1]} : vector<2x128xf32> to vector<2x32xf32>
    %88 = vector.extract_strided_slice %86 {offsets = [0, 32], sizes = [2, 32], strides = [1, 1]} : vector<2x128xf32> to vector<2x32xf32>
    %89 = vector.extract_strided_slice %86 {offsets = [0, 64], sizes = [2, 32], strides = [1, 1]} : vector<2x128xf32> to vector<2x32xf32>
    %90 = vector.extract_strided_slice %86 {offsets = [0, 96], sizes = [2, 32], strides = [1, 1]} : vector<2x128xf32> to vector<2x32xf32>
    %91 = arith.mulf %88, %49 : vector<2x32xf32>
    %92 = arith.mulf %87, %89 : vector<2x32xf32>
    %93 = arith.addf %91, %92 : vector<2x32xf32>
    %94 = math.tanh %93 : vector<2x32xf32>
    %95 = arith.mulf %90, %94 : vector<2x32xf32>
    %96 = arith.truncf %95 : vector<2x32xf32> to vector<2x32xbf16>
    %cst_27 = arith.constant dense<0.000000e+00> : vector<2x128xf32>
    %97 = tpu.matmul %96, %2, %cst_27 {dimension_numbers = #tpu.dot_dimension_numbers<[1], [0], [0], [1], [0, 0, 1, 1], [], []>} : vector<2x32xbf16>, vector<32x128xbf16>, vector<2x128xf32> -> vector<2x128xf32>
    %98 = arith.addf %75, %97 : vector<2x128xf32>
    %99 = arith.negf %98 : vector<2x128xf32>
    %100 = math.exp %99 : vector<2x128xf32>
    %cst_28 = arith.constant 1.000000e+00 : f32
    %101 = vector.broadcast %cst_28 : f32 to vector<2x128xf32>
    %102 = arith.addf %101, %100 : vector<2x128xf32>
    %103 = arith.divf %101, %102 : vector<2x128xf32>
    %104 = math.tanh %98 : vector<2x128xf32>
    %105 = arith.select %23, %104, %103 : vector<2x128xi1>, vector<2x128xf32>
    %106 = vector.extract_strided_slice %105 {offsets = [0, 0], sizes = [2, 32], strides = [1, 1]} : vector<2x128xf32> to vector<2x32xf32>
    %107 = vector.extract_strided_slice %105 {offsets = [0, 32], sizes = [2, 32], strides = [1, 1]} : vector<2x128xf32> to vector<2x32xf32>
    %108 = vector.extract_strided_slice %105 {offsets = [0, 64], sizes = [2, 32], strides = [1, 1]} : vector<2x128xf32> to vector<2x32xf32>
    %109 = vector.extract_strided_slice %105 {offsets = [0, 96], sizes = [2, 32], strides = [1, 1]} : vector<2x128xf32> to vector<2x32xf32>
    %110 = arith.mulf %107, %68 : vector<2x32xf32>
    %111 = arith.mulf %106, %108 : vector<2x32xf32>
    %112 = arith.addf %110, %111 : vector<2x32xf32>
    %113 = math.tanh %112 : vector<2x32xf32>
    %114 = arith.mulf %109, %113 : vector<2x32xf32>
    %c2_29 = arith.constant 2 : index
    %c0_30 = arith.constant 0 : index
    %115 = vector.load %arg6[%c2_29, %c0_30] : memref<16x32xf32, #tpu.memory_space<vmem>>, vector<2x32xf32>
    tpu.vector_store %arg6[%c2_29, %c0_30], %114 {strides = array<i32>} : memref<16x32xf32, #tpu.memory_space<vmem>>, vector<2x32xf32>,
    %116 = arith.truncf %114 : vector<2x32xf32> to vector<2x32xbf16>
    %cst_31 = arith.constant dense<0.000000e+00> : vector<2x128xf32>
    %117 = tpu.matmul %116, %3, %cst_31 {dimension_numbers = #tpu.dot_dimension_numbers<[1], [0], [0], [1], [0, 0, 1, 1], [], []>} : vector<2x32xbf16>, vector<32x128xbf16>, vector<2x128xf32> -> vector<2x128xf32>
    %118 = vector.broadcast %6 : vector<1x128xf32> to vector<2x128xf32>
    %119 = arith.addf %117, %118 : vector<2x128xf32>
    %120 = vector.extract_strided_slice %17 {offsets = [4, 0], sizes = [2, 128], strides = [1, 1]} : vector<16x128xf32> to vector<2x128xf32>
    %121 = arith.truncf %95 : vector<2x32xf32> to vector<2x32xbf16>
    %cst_32 = arith.constant dense<0.000000e+00> : vector<2x128xf32>
    %122 = tpu.matmul %121, %1, %cst_32 {dimension_numbers = #tpu.dot_dimension_numbers<[1], [0], [0], [1], [0, 0, 1, 1], [], []>} : vector<2x32xbf16>, vector<32x128xbf16>, vector<2x128xf32> -> vector<2x128xf32>
    %123 = arith.addf %120, %122 : vector<2x128xf32>
    %124 = arith.negf %123 : vector<2x128xf32>
    %125 = math.exp %124 : vector<2x128xf32>
    %cst_33 = arith.constant 1.000000e+00 : f32
    %126 = vector.broadcast %cst_33 : f32 to vector<2x128xf32>
    %127 = arith.addf %126, %125 : vector<2x128xf32>
    %128 = arith.divf %126, %127 : vector<2x128xf32>
    %129 = math.tanh %123 : vector<2x128xf32>
    %130 = arith.select %23, %129, %128 : vector<2x128xi1>, vector<2x128xf32>
    %131 = vector.extract_strided_slice %130 {offsets = [0, 0], sizes = [2, 32], strides = [1, 1]} : vector<2x128xf32> to vector<2x32xf32>
    %132 = vector.extract_strided_slice %130 {offsets = [0, 32], sizes = [2, 32], strides = [1, 1]} : vector<2x128xf32> to vector<2x32xf32>
    %133 = vector.extract_strided_slice %130 {offsets = [0, 64], sizes = [2, 32], strides = [1, 1]} : vector<2x128xf32> to vector<2x32xf32>
    %134 = vector.extract_strided_slice %130 {offsets = [0, 96], sizes = [2, 32], strides = [1, 1]} : vector<2x128xf32> to vector<2x32xf32>
    %135 = arith.mulf %132, %93 : vector<2x32xf32>
    %136 = arith.mulf %131, %133 : vector<2x32xf32>
    %137 = arith.addf %135, %136 : vector<2x32xf32>
    %138 = math.tanh %137 : vector<2x32xf32>
    %139 = arith.mulf %134, %138 : vector<2x32xf32>
    %140 = arith.truncf %139 : vector<2x32xf32> to vector<2x32xbf16>
    %cst_34 = arith.constant dense<0.000000e+00> : vector<2x128xf32>
    %141 = tpu.matmul %140, %2, %cst_34 {dimension_numbers = #tpu.dot_dimension_numbers<[1], [0], [0], [1], [0, 0, 1, 1], [], []>} : vector<2x32xbf16>, vector<32x128xbf16>, vector<2x128xf32> -> vector<2x128xf32>
    %142 = arith.addf %119, %141 : vector<2x128xf32>
    %143 = arith.negf %142 : vector<2x128xf32>
    %144 = math.exp %143 : vector<2x128xf32>
    %cst_35 = arith.constant 1.000000e+00 : f32
    %145 = vector.broadcast %cst_35 : f32 to vector<2x128xf32>
    %146 = arith.addf %145, %144 : vector<2x128xf32>
    %147 = arith.divf %145, %146 : vector<2x128xf32>
    %148 = math.tanh %142 : vector<2x128xf32>
    %149 = arith.select %23, %148, %147 : vector<2x128xi1>, vector<2x128xf32>
    %150 = vector.extract_strided_slice %149 {offsets = [0, 0], sizes = [2, 32], strides = [1, 1]} : vector<2x128xf32> to vector<2x32xf32>
    %151 = vector.extract_strided_slice %149 {offsets = [0, 32], sizes = [2, 32], strides = [1, 1]} : vector<2x128xf32> to vector<2x32xf32>
    %152 = vector.extract_strided_slice %149 {offsets = [0, 64], sizes = [2, 32], strides = [1, 1]} : vector<2x128xf32> to vector<2x32xf32>
    %153 = vector.extract_strided_slice %149 {offsets = [0, 96], sizes = [2, 32], strides = [1, 1]} : vector<2x128xf32> to vector<2x32xf32>
    %154 = arith.mulf %151, %112 : vector<2x32xf32>
    %155 = arith.mulf %150, %152 : vector<2x32xf32>
    %156 = arith.addf %154, %155 : vector<2x32xf32>
    %157 = math.tanh %156 : vector<2x32xf32>
    %158 = arith.mulf %153, %157 : vector<2x32xf32>
    %c4_36 = arith.constant 4 : index
    %c0_37 = arith.constant 0 : index
    %159 = vector.load %arg6[%c4_36, %c0_37] : memref<16x32xf32, #tpu.memory_space<vmem>>, vector<2x32xf32>
    tpu.vector_store %arg6[%c4_36, %c0_37], %158 {strides = array<i32>} : memref<16x32xf32, #tpu.memory_space<vmem>>, vector<2x32xf32>,
    %160 = arith.truncf %158 : vector<2x32xf32> to vector<2x32xbf16>
    %cst_38 = arith.constant dense<0.000000e+00> : vector<2x128xf32>
    %161 = tpu.matmul %160, %3, %cst_38 {dimension_numbers = #tpu.dot_dimension_numbers<[1], [0], [0], [1], [0, 0, 1, 1], [], []>} : vector<2x32xbf16>, vector<32x128xbf16>, vector<2x128xf32> -> vector<2x128xf32>
    %162 = vector.broadcast %6 : vector<1x128xf32> to vector<2x128xf32>
    %163 = arith.addf %161, %162 : vector<2x128xf32>
    %164 = vector.extract_strided_slice %17 {offsets = [6, 0], sizes = [2, 128], strides = [1, 1]} : vector<16x128xf32> to vector<2x128xf32>
    %165 = arith.truncf %139 : vector<2x32xf32> to vector<2x32xbf16>
    %cst_39 = arith.constant dense<0.000000e+00> : vector<2x128xf32>
    %166 = tpu.matmul %165, %1, %cst_39 {dimension_numbers = #tpu.dot_dimension_numbers<[1], [0], [0], [1], [0, 0, 1, 1], [], []>} : vector<2x32xbf16>, vector<32x128xbf16>, vector<2x128xf32> -> vector<2x128xf32>
    %167 = arith.addf %164, %166 : vector<2x128xf32>
    %168 = arith.negf %167 : vector<2x128xf32>
    %169 = math.exp %168 : vector<2x128xf32>
    %cst_40 = arith.constant 1.000000e+00 : f32
    %170 = vector.broadcast %cst_40 : f32 to vector<2x128xf32>
    %171 = arith.addf %170, %169 : vector<2x128xf32>
    %172 = arith.divf %170, %171 : vector<2x128xf32>
    %173 = math.tanh %167 : vector<2x128xf32>
    %174 = arith.select %23, %173, %172 : vector<2x128xi1>, vector<2x128xf32>
    %175 = vector.extract_strided_slice %174 {offsets = [0, 0], sizes = [2, 32], strides = [1, 1]} : vector<2x128xf32> to vector<2x32xf32>
    %176 = vector.extract_strided_slice %174 {offsets = [0, 32], sizes = [2, 32], strides = [1, 1]} : vector<2x128xf32> to vector<2x32xf32>
    %177 = vector.extract_strided_slice %174 {offsets = [0, 64], sizes = [2, 32], strides = [1, 1]} : vector<2x128xf32> to vector<2x32xf32>
    %178 = vector.extract_strided_slice %174 {offsets = [0, 96], sizes = [2, 32], strides = [1, 1]} : vector<2x128xf32> to vector<2x32xf32>
    %179 = arith.mulf %176, %137 : vector<2x32xf32>
    %180 = arith.mulf %175, %177 : vector<2x32xf32>
    %181 = arith.addf %179, %180 : vector<2x32xf32>
    %182 = math.tanh %181 : vector<2x32xf32>
    %183 = arith.mulf %178, %182 : vector<2x32xf32>
    %184 = arith.truncf %183 : vector<2x32xf32> to vector<2x32xbf16>
    %cst_41 = arith.constant dense<0.000000e+00> : vector<2x128xf32>
    %185 = tpu.matmul %184, %2, %cst_41 {dimension_numbers = #tpu.dot_dimension_numbers<[1], [0], [0], [1], [0, 0, 1, 1], [], []>} : vector<2x32xbf16>, vector<32x128xbf16>, vector<2x128xf32> -> vector<2x128xf32>
    %186 = arith.addf %163, %185 : vector<2x128xf32>
    %187 = arith.negf %186 : vector<2x128xf32>
    %188 = math.exp %187 : vector<2x128xf32>
    %cst_42 = arith.constant 1.000000e+00 : f32
    %189 = vector.broadcast %cst_42 : f32 to vector<2x128xf32>
    %190 = arith.addf %189, %188 : vector<2x128xf32>
    %191 = arith.divf %189, %190 : vector<2x128xf32>
    %192 = math.tanh %186 : vector<2x128xf32>
    %193 = arith.select %23, %192, %191 : vector<2x128xi1>, vector<2x128xf32>
    %194 = vector.extract_strided_slice %193 {offsets = [0, 0], sizes = [2, 32], strides = [1, 1]} : vector<2x128xf32> to vector<2x32xf32>
    %195 = vector.extract_strided_slice %193 {offsets = [0, 32], sizes = [2, 32], strides = [1, 1]} : vector<2x128xf32> to vector<2x32xf32>
    %196 = vector.extract_strided_slice %193 {offsets = [0, 64], sizes = [2, 32], strides = [1, 1]} : vector<2x128xf32> to vector<2x32xf32>
    %197 = vector.extract_strided_slice %193 {offsets = [0, 96], sizes = [2, 32], strides = [1, 1]} : vector<2x128xf32> to vector<2x32xf32>
    %198 = arith.mulf %195, %156 : vector<2x32xf32>
    %199 = arith.mulf %194, %196 : vector<2x32xf32>
    %200 = arith.addf %198, %199 : vector<2x32xf32>
    %201 = math.tanh %200 : vector<2x32xf32>
    %202 = arith.mulf %197, %201 : vector<2x32xf32>
    %c6_43 = arith.constant 6 : index
    %c0_44 = arith.constant 0 : index
    %203 = vector.load %arg6[%c6_43, %c0_44] : memref<16x32xf32, #tpu.memory_space<vmem>>, vector<2x32xf32>
    tpu.vector_store %arg6[%c6_43, %c0_44], %202 {strides = array<i32>} : memref<16x32xf32, #tpu.memory_space<vmem>>, vector<2x32xf32>,
    %204 = arith.truncf %202 : vector<2x32xf32> to vector<2x32xbf16>
    %cst_45 = arith.constant dense<0.000000e+00> : vector<2x128xf32>
    %205 = tpu.matmul %204, %3, %cst_45 {dimension_numbers = #tpu.dot_dimension_numbers<[1], [0], [0], [1], [0, 0, 1, 1], [], []>} : vector<2x32xbf16>, vector<32x128xbf16>, vector<2x128xf32> -> vector<2x128xf32>
    %206 = vector.broadcast %6 : vector<1x128xf32> to vector<2x128xf32>
    %207 = arith.addf %205, %206 : vector<2x128xf32>
    %208 = vector.extract_strided_slice %17 {offsets = [8, 0], sizes = [2, 128], strides = [1, 1]} : vector<16x128xf32> to vector<2x128xf32>
    %209 = arith.truncf %183 : vector<2x32xf32> to vector<2x32xbf16>
    %cst_46 = arith.constant dense<0.000000e+00> : vector<2x128xf32>
    %210 = tpu.matmul %209, %1, %cst_46 {dimension_numbers = #tpu.dot_dimension_numbers<[1], [0], [0], [1], [0, 0, 1, 1], [], []>} : vector<2x32xbf16>, vector<32x128xbf16>, vector<2x128xf32> -> vector<2x128xf32>
    %211 = arith.addf %208, %210 : vector<2x128xf32>
    %212 = arith.negf %211 : vector<2x128xf32>
    %213 = math.exp %212 : vector<2x128xf32>
    %cst_47 = arith.constant 1.000000e+00 : f32
    %214 = vector.broadcast %cst_47 : f32 to vector<2x128xf32>
    %215 = arith.addf %214, %213 : vector<2x128xf32>
    %216 = arith.divf %214, %215 : vector<2x128xf32>
    %217 = math.tanh %211 : vector<2x128xf32>
    %218 = arith.select %23, %217, %216 : vector<2x128xi1>, vector<2x128xf32>
    %219 = vector.extract_strided_slice %218 {offsets = [0, 0], sizes = [2, 32], strides = [1, 1]} : vector<2x128xf32> to vector<2x32xf32>
    %220 = vector.extract_strided_slice %218 {offsets = [0, 32], sizes = [2, 32], strides = [1, 1]} : vector<2x128xf32> to vector<2x32xf32>
    %221 = vector.extract_strided_slice %218 {offsets = [0, 64], sizes = [2, 32], strides = [1, 1]} : vector<2x128xf32> to vector<2x32xf32>
    %222 = vector.extract_strided_slice %218 {offsets = [0, 96], sizes = [2, 32], strides = [1, 1]} : vector<2x128xf32> to vector<2x32xf32>
    %223 = arith.mulf %220, %181 : vector<2x32xf32>
    %224 = arith.mulf %219, %221 : vector<2x32xf32>
    %225 = arith.addf %223, %224 : vector<2x32xf32>
    %226 = math.tanh %225 : vector<2x32xf32>
    %227 = arith.mulf %222, %226 : vector<2x32xf32>
    %228 = arith.truncf %227 : vector<2x32xf32> to vector<2x32xbf16>
    %cst_48 = arith.constant dense<0.000000e+00> : vector<2x128xf32>
    %229 = tpu.matmul %228, %2, %cst_48 {dimension_numbers = #tpu.dot_dimension_numbers<[1], [0], [0], [1], [0, 0, 1, 1], [], []>} : vector<2x32xbf16>, vector<32x128xbf16>, vector<2x128xf32> -> vector<2x128xf32>
    %230 = arith.addf %207, %229 : vector<2x128xf32>
    %231 = arith.negf %230 : vector<2x128xf32>
    %232 = math.exp %231 : vector<2x128xf32>
    %cst_49 = arith.constant 1.000000e+00 : f32
    %233 = vector.broadcast %cst_49 : f32 to vector<2x128xf32>
    %234 = arith.addf %233, %232 : vector<2x128xf32>
    %235 = arith.divf %233, %234 : vector<2x128xf32>
    %236 = math.tanh %230 : vector<2x128xf32>
    %237 = arith.select %23, %236, %235 : vector<2x128xi1>, vector<2x128xf32>
    %238 = vector.extract_strided_slice %237 {offsets = [0, 0], sizes = [2, 32], strides = [1, 1]} : vector<2x128xf32> to vector<2x32xf32>
    %239 = vector.extract_strided_slice %237 {offsets = [0, 32], sizes = [2, 32], strides = [1, 1]} : vector<2x128xf32> to vector<2x32xf32>
    %240 = vector.extract_strided_slice %237 {offsets = [0, 64], sizes = [2, 32], strides = [1, 1]} : vector<2x128xf32> to vector<2x32xf32>
    %241 = vector.extract_strided_slice %237 {offsets = [0, 96], sizes = [2, 32], strides = [1, 1]} : vector<2x128xf32> to vector<2x32xf32>
    %242 = arith.mulf %239, %200 : vector<2x32xf32>
    %243 = arith.mulf %238, %240 : vector<2x32xf32>
    %244 = arith.addf %242, %243 : vector<2x32xf32>
    %245 = math.tanh %244 : vector<2x32xf32>
    %246 = arith.mulf %241, %245 : vector<2x32xf32>
    %c8 = arith.constant 8 : index
    %c0_50 = arith.constant 0 : index
    %247 = vector.load %arg6[%c8, %c0_50] : memref<16x32xf32, #tpu.memory_space<vmem>>, vector<2x32xf32>
    tpu.vector_store %arg6[%c8, %c0_50], %246 {strides = array<i32>} : memref<16x32xf32, #tpu.memory_space<vmem>>, vector<2x32xf32>,
    %248 = arith.truncf %246 : vector<2x32xf32> to vector<2x32xbf16>
    %cst_51 = arith.constant dense<0.000000e+00> : vector<2x128xf32>
    %249 = tpu.matmul %248, %3, %cst_51 {dimension_numbers = #tpu.dot_dimension_numbers<[1], [0], [0], [1], [0, 0, 1, 1], [], []>} : vector<2x32xbf16>, vector<32x128xbf16>, vector<2x128xf32> -> vector<2x128xf32>
    %250 = vector.broadcast %6 : vector<1x128xf32> to vector<2x128xf32>
    %251 = arith.addf %249, %250 : vector<2x128xf32>
    %252 = vector.extract_strided_slice %17 {offsets = [10, 0], sizes = [2, 128], strides = [1, 1]} : vector<16x128xf32> to vector<2x128xf32>
    %253 = arith.truncf %227 : vector<2x32xf32> to vector<2x32xbf16>
    %cst_52 = arith.constant dense<0.000000e+00> : vector<2x128xf32>
    %254 = tpu.matmul %253, %1, %cst_52 {dimension_numbers = #tpu.dot_dimension_numbers<[1], [0], [0], [1], [0, 0, 1, 1], [], []>} : vector<2x32xbf16>, vector<32x128xbf16>, vector<2x128xf32> -> vector<2x128xf32>
    %255 = arith.addf %252, %254 : vector<2x128xf32>
    %256 = arith.negf %255 : vector<2x128xf32>
    %257 = math.exp %256 : vector<2x128xf32>
    %cst_53 = arith.constant 1.000000e+00 : f32
    %258 = vector.broadcast %cst_53 : f32 to vector<2x128xf32>
    %259 = arith.addf %258, %257 : vector<2x128xf32>
    %260 = arith.divf %258, %259 : vector<2x128xf32>
    %261 = math.tanh %255 : vector<2x128xf32>
    %262 = arith.select %23, %261, %260 : vector<2x128xi1>, vector<2x128xf32>
    %263 = vector.extract_strided_slice %262 {offsets = [0, 0], sizes = [2, 32], strides = [1, 1]} : vector<2x128xf32> to vector<2x32xf32>
    %264 = vector.extract_strided_slice %262 {offsets = [0, 32], sizes = [2, 32], strides = [1, 1]} : vector<2x128xf32> to vector<2x32xf32>
    %265 = vector.extract_strided_slice %262 {offsets = [0, 64], sizes = [2, 32], strides = [1, 1]} : vector<2x128xf32> to vector<2x32xf32>
    %266 = vector.extract_strided_slice %262 {offsets = [0, 96], sizes = [2, 32], strides = [1, 1]} : vector<2x128xf32> to vector<2x32xf32>
    %267 = arith.mulf %264, %225 : vector<2x32xf32>
    %268 = arith.mulf %263, %265 : vector<2x32xf32>
    %269 = arith.addf %267, %268 : vector<2x32xf32>
    %270 = math.tanh %269 : vector<2x32xf32>
    %271 = arith.mulf %266, %270 : vector<2x32xf32>
    %272 = arith.truncf %271 : vector<2x32xf32> to vector<2x32xbf16>
    %cst_54 = arith.constant dense<0.000000e+00> : vector<2x128xf32>
    %273 = tpu.matmul %272, %2, %cst_54 {dimension_numbers = #tpu.dot_dimension_numbers<[1], [0], [0], [1], [0, 0, 1, 1], [], []>} : vector<2x32xbf16>, vector<32x128xbf16>, vector<2x128xf32> -> vector<2x128xf32>
    %274 = arith.addf %251, %273 : vector<2x128xf32>
    %275 = arith.negf %274 : vector<2x128xf32>
    %276 = math.exp %275 : vector<2x128xf32>
    %cst_55 = arith.constant 1.000000e+00 : f32
    %277 = vector.broadcast %cst_55 : f32 to vector<2x128xf32>
    %278 = arith.addf %277, %276 : vector<2x128xf32>
    %279 = arith.divf %277, %278 : vector<2x128xf32>
    %280 = math.tanh %274 : vector<2x128xf32>
    %281 = arith.select %23, %280, %279 : vector<2x128xi1>, vector<2x128xf32>
    %282 = vector.extract_strided_slice %281 {offsets = [0, 0], sizes = [2, 32], strides = [1, 1]} : vector<2x128xf32> to vector<2x32xf32>
    %283 = vector.extract_strided_slice %281 {offsets = [0, 32], sizes = [2, 32], strides = [1, 1]} : vector<2x128xf32> to vector<2x32xf32>
    %284 = vector.extract_strided_slice %281 {offsets = [0, 64], sizes = [2, 32], strides = [1, 1]} : vector<2x128xf32> to vector<2x32xf32>
    %285 = vector.extract_strided_slice %281 {offsets = [0, 96], sizes = [2, 32], strides = [1, 1]} : vector<2x128xf32> to vector<2x32xf32>
    %286 = arith.mulf %283, %244 : vector<2x32xf32>
    %287 = arith.mulf %282, %284 : vector<2x32xf32>
    %288 = arith.addf %286, %287 : vector<2x32xf32>
    %289 = math.tanh %288 : vector<2x32xf32>
    %290 = arith.mulf %285, %289 : vector<2x32xf32>
    %c10 = arith.constant 10 : index
    %c0_56 = arith.constant 0 : index
    %291 = vector.load %arg6[%c10, %c0_56] : memref<16x32xf32, #tpu.memory_space<vmem>>, vector<2x32xf32>
    tpu.vector_store %arg6[%c10, %c0_56], %290 {strides = array<i32>} : memref<16x32xf32, #tpu.memory_space<vmem>>, vector<2x32xf32>,
    %292 = arith.truncf %290 : vector<2x32xf32> to vector<2x32xbf16>
    %cst_57 = arith.constant dense<0.000000e+00> : vector<2x128xf32>
    %293 = tpu.matmul %292, %3, %cst_57 {dimension_numbers = #tpu.dot_dimension_numbers<[1], [0], [0], [1], [0, 0, 1, 1], [], []>} : vector<2x32xbf16>, vector<32x128xbf16>, vector<2x128xf32> -> vector<2x128xf32>
    %294 = vector.broadcast %6 : vector<1x128xf32> to vector<2x128xf32>
    %295 = arith.addf %293, %294 : vector<2x128xf32>
    %296 = vector.extract_strided_slice %17 {offsets = [12, 0], sizes = [2, 128], strides = [1, 1]} : vector<16x128xf32> to vector<2x128xf32>
    %297 = arith.truncf %271 : vector<2x32xf32> to vector<2x32xbf16>
    %cst_58 = arith.constant dense<0.000000e+00> : vector<2x128xf32>
    %298 = tpu.matmul %297, %1, %cst_58 {dimension_numbers = #tpu.dot_dimension_numbers<[1], [0], [0], [1], [0, 0, 1, 1], [], []>} : vector<2x32xbf16>, vector<32x128xbf16>, vector<2x128xf32> -> vector<2x128xf32>
    %299 = arith.addf %296, %298 : vector<2x128xf32>
    %300 = arith.negf %299 : vector<2x128xf32>
    %301 = math.exp %300 : vector<2x128xf32>
    %cst_59 = arith.constant 1.000000e+00 : f32
    %302 = vector.broadcast %cst_59 : f32 to vector<2x128xf32>
    %303 = arith.addf %302, %301 : vector<2x128xf32>
    %304 = arith.divf %302, %303 : vector<2x128xf32>
    %305 = math.tanh %299 : vector<2x128xf32>
    %306 = arith.select %23, %305, %304 : vector<2x128xi1>, vector<2x128xf32>
    %307 = vector.extract_strided_slice %306 {offsets = [0, 0], sizes = [2, 32], strides = [1, 1]} : vector<2x128xf32> to vector<2x32xf32>
    %308 = vector.extract_strided_slice %306 {offsets = [0, 32], sizes = [2, 32], strides = [1, 1]} : vector<2x128xf32> to vector<2x32xf32>
    %309 = vector.extract_strided_slice %306 {offsets = [0, 64], sizes = [2, 32], strides = [1, 1]} : vector<2x128xf32> to vector<2x32xf32>
    %310 = vector.extract_strided_slice %306 {offsets = [0, 96], sizes = [2, 32], strides = [1, 1]} : vector<2x128xf32> to vector<2x32xf32>
    %311 = arith.mulf %308, %269 : vector<2x32xf32>
    %312 = arith.mulf %307, %309 : vector<2x32xf32>
    %313 = arith.addf %311, %312 : vector<2x32xf32>
    %314 = math.tanh %313 : vector<2x32xf32>
    %315 = arith.mulf %310, %314 : vector<2x32xf32>
    %316 = arith.truncf %315 : vector<2x32xf32> to vector<2x32xbf16>
    %cst_60 = arith.constant dense<0.000000e+00> : vector<2x128xf32>
    %317 = tpu.matmul %316, %2, %cst_60 {dimension_numbers = #tpu.dot_dimension_numbers<[1], [0], [0], [1], [0, 0, 1, 1], [], []>} : vector<2x32xbf16>, vector<32x128xbf16>, vector<2x128xf32> -> vector<2x128xf32>
    %318 = arith.addf %295, %317 : vector<2x128xf32>
    %319 = arith.negf %318 : vector<2x128xf32>
    %320 = math.exp %319 : vector<2x128xf32>
    %cst_61 = arith.constant 1.000000e+00 : f32
    %321 = vector.broadcast %cst_61 : f32 to vector<2x128xf32>
    %322 = arith.addf %321, %320 : vector<2x128xf32>
    %323 = arith.divf %321, %322 : vector<2x128xf32>
    %324 = math.tanh %318 : vector<2x128xf32>
    %325 = arith.select %23, %324, %323 : vector<2x128xi1>, vector<2x128xf32>
    %326 = vector.extract_strided_slice %325 {offsets = [0, 0], sizes = [2, 32], strides = [1, 1]} : vector<2x128xf32> to vector<2x32xf32>
    %327 = vector.extract_strided_slice %325 {offsets = [0, 32], sizes = [2, 32], strides = [1, 1]} : vector<2x128xf32> to vector<2x32xf32>
    %328 = vector.extract_strided_slice %325 {offsets = [0, 64], sizes = [2, 32], strides = [1, 1]} : vector<2x128xf32> to vector<2x32xf32>
    %329 = vector.extract_strided_slice %325 {offsets = [0, 96], sizes = [2, 32], strides = [1, 1]} : vector<2x128xf32> to vector<2x32xf32>
    %330 = arith.mulf %327, %288 : vector<2x32xf32>
    %331 = arith.mulf %326, %328 : vector<2x32xf32>
    %332 = arith.addf %330, %331 : vector<2x32xf32>
    %333 = math.tanh %332 : vector<2x32xf32>
    %334 = arith.mulf %329, %333 : vector<2x32xf32>
    %c12 = arith.constant 12 : index
    %c0_62 = arith.constant 0 : index
    %335 = vector.load %arg6[%c12, %c0_62] : memref<16x32xf32, #tpu.memory_space<vmem>>, vector<2x32xf32>
    tpu.vector_store %arg6[%c12, %c0_62], %334 {strides = array<i32>} : memref<16x32xf32, #tpu.memory_space<vmem>>, vector<2x32xf32>,
    %336 = arith.truncf %334 : vector<2x32xf32> to vector<2x32xbf16>
    %cst_63 = arith.constant dense<0.000000e+00> : vector<2x128xf32>
    %337 = tpu.matmul %336, %3, %cst_63 {dimension_numbers = #tpu.dot_dimension_numbers<[1], [0], [0], [1], [0, 0, 1, 1], [], []>} : vector<2x32xbf16>, vector<32x128xbf16>, vector<2x128xf32> -> vector<2x128xf32>
    %338 = vector.broadcast %6 : vector<1x128xf32> to vector<2x128xf32>
    %339 = arith.addf %337, %338 : vector<2x128xf32>
    %340 = vector.extract_strided_slice %17 {offsets = [14, 0], sizes = [2, 128], strides = [1, 1]} : vector<16x128xf32> to vector<2x128xf32>
    %341 = arith.truncf %315 : vector<2x32xf32> to vector<2x32xbf16>
    %cst_64 = arith.constant dense<0.000000e+00> : vector<2x128xf32>
    %342 = tpu.matmul %341, %1, %cst_64 {dimension_numbers = #tpu.dot_dimension_numbers<[1], [0], [0], [1], [0, 0, 1, 1], [], []>} : vector<2x32xbf16>, vector<32x128xbf16>, vector<2x128xf32> -> vector<2x128xf32>
    %343 = arith.addf %340, %342 : vector<2x128xf32>
    %344 = arith.negf %343 : vector<2x128xf32>
    %345 = math.exp %344 : vector<2x128xf32>
    %cst_65 = arith.constant 1.000000e+00 : f32
    %346 = vector.broadcast %cst_65 : f32 to vector<2x128xf32>
    %347 = arith.addf %346, %345 : vector<2x128xf32>
    %348 = arith.divf %346, %347 : vector<2x128xf32>
    %349 = math.tanh %343 : vector<2x128xf32>
    %350 = arith.select %23, %349, %348 : vector<2x128xi1>, vector<2x128xf32>
    %351 = vector.extract_strided_slice %350 {offsets = [0, 0], sizes = [2, 32], strides = [1, 1]} : vector<2x128xf32> to vector<2x32xf32>
    %352 = vector.extract_strided_slice %350 {offsets = [0, 32], sizes = [2, 32], strides = [1, 1]} : vector<2x128xf32> to vector<2x32xf32>
    %353 = vector.extract_strided_slice %350 {offsets = [0, 64], sizes = [2, 32], strides = [1, 1]} : vector<2x128xf32> to vector<2x32xf32>
    %354 = vector.extract_strided_slice %350 {offsets = [0, 96], sizes = [2, 32], strides = [1, 1]} : vector<2x128xf32> to vector<2x32xf32>
    %355 = arith.mulf %352, %313 : vector<2x32xf32>
    %356 = arith.mulf %351, %353 : vector<2x32xf32>
    %357 = arith.addf %355, %356 : vector<2x32xf32>
    %358 = math.tanh %357 : vector<2x32xf32>
    %359 = arith.mulf %354, %358 : vector<2x32xf32>
    %360 = arith.truncf %359 : vector<2x32xf32> to vector<2x32xbf16>
    %cst_66 = arith.constant dense<0.000000e+00> : vector<2x128xf32>
    %361 = tpu.matmul %360, %2, %cst_66 {dimension_numbers = #tpu.dot_dimension_numbers<[1], [0], [0], [1], [0, 0, 1, 1], [], []>} : vector<2x32xbf16>, vector<32x128xbf16>, vector<2x128xf32> -> vector<2x128xf32>
    %362 = arith.addf %339, %361 : vector<2x128xf32>
    %363 = arith.negf %362 : vector<2x128xf32>
    %364 = math.exp %363 : vector<2x128xf32>
    %cst_67 = arith.constant 1.000000e+00 : f32
    %365 = vector.broadcast %cst_67 : f32 to vector<2x128xf32>
    %366 = arith.addf %365, %364 : vector<2x128xf32>
    %367 = arith.divf %365, %366 : vector<2x128xf32>
    %368 = math.tanh %362 : vector<2x128xf32>
    %369 = arith.select %23, %368, %367 : vector<2x128xi1>, vector<2x128xf32>
    %370 = vector.extract_strided_slice %369 {offsets = [0, 0], sizes = [2, 32], strides = [1, 1]} : vector<2x128xf32> to vector<2x32xf32>
    %371 = vector.extract_strided_slice %369 {offsets = [0, 32], sizes = [2, 32], strides = [1, 1]} : vector<2x128xf32> to vector<2x32xf32>
    %372 = vector.extract_strided_slice %369 {offsets = [0, 64], sizes = [2, 32], strides = [1, 1]} : vector<2x128xf32> to vector<2x32xf32>
    %373 = vector.extract_strided_slice %369 {offsets = [0, 96], sizes = [2, 32], strides = [1, 1]} : vector<2x128xf32> to vector<2x32xf32>
    %374 = arith.mulf %371, %332 : vector<2x32xf32>
    %375 = arith.mulf %370, %372 : vector<2x32xf32>
    %376 = arith.addf %374, %375 : vector<2x32xf32>
    %377 = math.tanh %376 : vector<2x32xf32>
    %378 = arith.mulf %373, %377 : vector<2x32xf32>
    %c14 = arith.constant 14 : index
    %c0_68 = arith.constant 0 : index
    %379 = vector.load %arg6[%c14, %c0_68] : memref<16x32xf32, #tpu.memory_space<vmem>>, vector<2x32xf32>
    tpu.vector_store %arg6[%c14, %c0_68], %378 {strides = array<i32>} : memref<16x32xf32, #tpu.memory_space<vmem>>, vector<2x32xf32>,
    %c0_69 = arith.constant 0 : index
    %c0_70 = arith.constant 0 : index
    %380 = vector.load %arg5[%c0_69, %c0_70] : memref<8x32xf32, #tpu.memory_space<vmem>>, vector<2x32xf32>
    tpu.vector_store %arg5[%c0_69, %c0_70], %359 {strides = array<i32>} : memref<8x32xf32, #tpu.memory_space<vmem>>, vector<2x32xf32>,
    %c2_71 = arith.constant 2 : index
    %c0_72 = arith.constant 0 : index
    %381 = vector.load %arg5[%c2_71, %c0_72] : memref<8x32xf32, #tpu.memory_space<vmem>>, vector<2x32xf32>
    tpu.vector_store %arg5[%c2_71, %c0_72], %378 {strides = array<i32>} : memref<8x32xf32, #tpu.memory_space<vmem>>, vector<2x32xf32>,
    %c4_73 = arith.constant 4 : index
    %c0_74 = arith.constant 0 : index
    %382 = vector.load %arg5[%c4_73, %c0_74] : memref<8x32xf32, #tpu.memory_space<vmem>>, vector<2x32xf32>
    tpu.vector_store %arg5[%c4_73, %c0_74], %357 {strides = array<i32>} : memref<8x32xf32, #tpu.memory_space<vmem>>, vector<2x32xf32>,
    %c6_75 = arith.constant 6 : index
    %c0_76 = arith.constant 0 : index
    %383 = vector.load %arg5[%c6_75, %c0_76] : memref<8x32xf32, #tpu.memory_space<vmem>>, vector<2x32xf32>
    tpu.vector_store %arg5[%c6_75, %c0_76], %376 {strides = array<i32>} : memref<8x32xf32, #tpu.memory_space<vmem>>, vector<2x32xf32>,
    %c0_77 = arith.constant 0 : index
    %c0_78 = arith.constant 0 : index
    %384 = vector.load %arg6[%c0_77, %c0_78] : memref<16x32xf32, #tpu.memory_space<vmem>>, vector<16x32xf32>
    %385 = arith.truncf %384 : vector<16x32xf32> to vector<16x32xbf16>
    %cst_79 = arith.constant dense<0.000000e+00> : vector<16x128xf32>
    %386 = tpu.matmul %385, %4, %cst_79 {dimension_numbers = #tpu.dot_dimension_numbers<[1], [0], [0], [1], [0, 0, 1, 1], [], []>} : vector<16x32xbf16>, vector<32x128xbf16>, vector<16x128xf32> -> vector<16x128xf32>
    %387 = vector.broadcast %7 : vector<1x128xf32> to vector<16x128xf32>
    %388 = arith.addf %386, %387 : vector<16x128xf32>
    %c0_80 = arith.constant 0 : index
    %c0_81 = arith.constant 0 : index
    %389 = vector.load %arg4[%c0_80, %c0_81] : memref<16x128xf32, #tpu.memory_space<vmem>>, vector<16x128xf32>
    tpu.vector_store %arg4[%c0_80, %c0_81], %388 {strides = array<i32>} : memref<16x128xf32, #tpu.memory_space<vmem>>, vector<16x128xf32>,
    return
  }
}

</mosaic_0001>

<bundles_post_ra>
// kernel: lstm_lm_forward.1
= control target key start
LH: loop header
LB: loop body
LE: loop exit
PB: predicated region body
PF: predicated region fallthrough
CT: control target
= control target key end

     0   :  { %v2363_v0 = vmov 0   ;;  %v2364_v3 = vmov 0.0   ;;  %vm2365_vm0 = vmmov 0   ;;  %vm161_vm1 = vcmask 261120   ;;  %s2366_s18 = smov 64   ;;  %s2367_s21 = smov 32   ;;  %s2928_s0 = inlined_call_operand.vmem [shape: s32[16,1], index: 0, kind: input, shape index: {}]   ;;  %s2929_s1 = inlined_call_operand.vmem [shape: bf16[192,128], index: 1, kind: input, shape index: {}]   ;;  %s2930_s3 = inlined_call_operand.vmem [shape: f32[8,32], index: 3, kind: input, shape index: {}]   ;;  %s2931_s2 = inlined_call_operand.vmem [shape: f32[3,128], index: 2, kind: input, shape index: {}]   ;;  %s2932_s5 = inlined_call_operand.vmem [shape: f32[8,32], index: 5, kind: output, shape index: {1}]   ;;  %s2933_s4 = inlined_call_operand.vmem [shape: f32[16,128], index: 4, kind: output, shape index: {0}]  }
   0x1   :  { %2215 = vset.pattern.permute.xlu0 %v2363_v0  ;;  %v47_v1 = vld [vmem:[%s2928_s0] sm:$0xff]  ;;  %v48_v2 = vld [vmem:[%s2928_s0 + $0x8] sm:$0xff]  ;;  %2009 = vmatprep.subr.bf16.mxu1 %v2364_v3  ;;  %v2217_v5 = vld [vmem:[%s2929_s1 + $0x18] sm:$0xff]   ;;  %v49_v16 = vlaneseq  ;;  %vm92_vm4 = vcmask 523264   ;;  %vm384_vm8 = vcmask 254976   ;;  %s2368_s17 = smov 96  }
   0x2   :  { %52 = vperm.xlu0 %2215, %v47_v1   ;;  %v2409_v4 = vld [vmem:[%s2929_s1 + $0x48] sm:$0xff]   ;;  %1997 = vmatprep.subr.bf16.mxu0 %v2364_v3  ;;  %v2423_v6 = vld [vmem:[%s2929_s1 + $0x40] sm:$0xff]   ;;  %v2219_v8 = vld [vmem:[%s2929_s1 + $0x10] sm:$0xff]   ;;  %vm1772_vm9 = vcmask 261126  }
   0x3   :  { %2013 = vmatprep.mubr.msk.bf16.mxu1 %vm2365_vm0, %v2364_v3  ;;  %2005 = vmatprep.mubr.msk.bf16.mxu0 %vm2365_vm0, %v2364_v3  ;;  %v141_v7 = vld [vmem:[%s2930_s3 + $0x2] sm:$0x3]  ;;  %v2437_v10 = vld [vmem:[%s2929_s1 + $0x28] sm:$0xff]   ;;  %v140_v13 = vld [vmem:[%s2930_s3] sm:$0x3]  ;;  %v50_v17 = vand.u32 127, %v49_v16 }
   0x4   :  { %2010 = vmatpush3.bf16.msra.mxu1 %v2409_v4  ;;  %1998 = vmatpush3.bf16.msra.mxu0 %v2217_v5  ;;  %v144_v9 = vpack.c.bf16 %v141_v7, %v141_v7  ;;  %v2221_v11 = vld [vmem:[%s2929_s1 + $0x8] sm:$0xff]   ;;  %v2447_v12 = vld [vmem:[%s2929_s1 + $0x20] sm:$0xff]   ;;  %v205_v15 = vpack.c.bf16 %v140_v13, %v140_v13  ;;  %v2503_v53 = vld [vmem:[%s2929_s1 + $0x38] sm:$0xff]  }
   0x5   :  { %2011 = vmatprep.subr.bf16.mxu1 %v2364_v3  ;;  %1999 = vmatprep.subr.bf16.mxu0 %v2364_v3  ;;  %v2223_v14 = vld [vmem:[%s2929_s1] sm:$0xff]   ;;  %vm137_vm5 = vcmp.ge.s32.totalorder %v50_v17, 64  ;;  %vm138_vm6 = vcmp.lt.s32.totalorder %v50_v17, 96  ;;  %v2509_v54 = vld [vmem:[%s2929_s1 + $0x30] sm:$0xff]  }
   0x6   :  { %55 = vperm.xlu0 %2215, %v48_v2   ;;  %v1860_v31 = vld [vmem:[%s2931_s2] ss:$0 sm:$0xff]  ;;  %vm2485_vm7 = vmand %vm137_vm5, %vm138_vm6  ;;  %v142_v46 = vld [vmem:[%s2930_s3 + $0x4] sm:$0x3] }
   0x7   :  { %v2533_v60 = vld [vmem:[%s2931_s2 + $0x1] ss:$0 sm:$0xff] }
   0x8   :  { %2012 = vmatpush3.bf16.msra.mxu1 %v2423_v6  ;;  %2000 = vmatpush3.bf16.msra.mxu0 %v2219_v8 }
   0x9   :  { %2017 = vmatprep.subr.bf16.mxu1 %v2364_v3  ;;  %2001 = vmatprep.subr.bf16.mxu0 %v2364_v3 }
   0xb   :  { %2014 = vmatmul.mubr.msk.bf16.vlgmr.msra.gmra.mxu1 %vm161_vm1, %v144_v9 }
   0xc   :  { %2018 = vmatpush3.bf16.msra.mxu1 %v2437_v10  ;;  %2021 = vmatprep.mubr.msk.bf16.mxu1 %vm2365_vm0, %v2364_v3 }
   0xd   :  { %2019 = vmatprep.subr.bf16.mxu1 %v2364_v3  ;;  %2002 = vmatpush3.bf16.msra.mxu0 %v2221_v11 }
   0xe   :  { %2003 = vmatprep.subr.bf16.mxu0 %v2364_v3 }
  0x10   :  { %2020 = vmatpush3.bf16.msra.mxu1 %v2447_v12 }
  0x11   :  { %2004 = vmatpush3.bf16.msra.mxu0 %v2223_v14  ;;  %2033 = vmatprep.subr.bf16.mxu1 %v2364_v3 }
  0x12   :  { %2025 = vmatprep.subr.bf16.mxu0 %v2364_v3 }
  0x13   :  { %2022 = vmatmul.mubr.msk.bf16.vlgmr.msra.gmra.mxu1 %vm161_vm1, %v205_v15 }
  0x14   :  { %2034 = vmatpush3.bf16.msra.mxu1 %v2409_v4  ;;  %2037 = vmatprep.mubr.msk.bf16.mxu1 %vm2365_vm0, %v2364_v3 }
  0x15   :  { %2035 = vmatprep.subr.bf16.mxu1 %v2364_v3 }
  0x18   :  { %2036 = vmatpush3.bf16.msra.mxu1 %v2423_v6 }
  0x19   :  { %2049 = vmatprep.subr.bf16.mxu1 %v2364_v3 }
  0x7d   :  { %v53_v18 = vpop.permute.xlu0 %52 }
  0x7e   :  { %vm57_vm2 = vcmp.eq.s32.totalorder %v50_v17, %v53_v18 }
  0x7f   :  { %v1858_v20 = vsel %vm57_vm2, 1.0, %v2364_v3 }
  0x81   :  { %v56_v19 = vpop.permute.xlu0 %55 }
  0x82   :  { %vm58_vm3 = vcmp.eq.s32.totalorder %v50_v17, %v56_v19 }
  0x83   :  { %v1859_v21 = vsel %vm58_vm3, 1.0, %v2364_v3 }
  0x84   :  { %v63_v22 = vpack.c.bf16 %v1859_v21, %v1858_v20 }
  0x86   :  { %2006 = vmatmul.mubr.msk.bf16.vlgmr.msra.gmra.mxu0 %vm92_vm4, %v63_v22 }
  0x87   :  { %2029 = vmatprep.mubr.msk.bf16.mxu0 %vm2365_vm0, %v2364_v3  ;;  %2026 = vmatpush3.bf16.msra.mxu0 %v2503_v53 }
  0x88   :  { %2027 = vmatprep.subr.bf16.mxu0 %v2364_v3 }
  0x8b   :  { %2028 = vmatpush3.bf16.msra.mxu0 %v2509_v54 }
  0x8c   :  { %2041 = vmatprep.subr.bf16.mxu0 %v2364_v3 }
  0xcb   :  { %v2475_v23 = vpop.f32.mrf.mxu1 }
  0xcc   :  { %v200_v61 = vadd.f32 %v2533_v60, %v2475_v23  ;;  %v143_v23 = vld [vmem:[%s2930_s3 + $0x6] sm:$0x3] }
  0xcd   :  { %v2015_v24 = vpop.f32.mrf.mxu1 }
  0xcf   :  { %v202_v25 = vpop.f32.mrf.mxu1 }
  0xd1   :  { %v2016_v26 = vpop.f32.mrf.mxu1 }
  0xd3   :  { %v255_v27 = vpop.f32.mrf.mxu1 }
  0xd5   :  { %v2023_v28 = vpop.f32.mrf.mxu1 }
  0xd7   :  { %v258_v29 = vpop.f32.mrf.mxu1 }
  0xd9   :  { %v2024_v30 = vpop.f32.mrf.mxu1 }
 0x146   :  { %v130_v32 = vpop.f32.mrf.mxu0 }
 0x147   :  { %v2480_v33 = vadd.f32 %v1860_v31, %v130_v32 }
 0x148   :  { %v2007_v34 = vpop.f32.mrf.mxu0 }
 0x149   :  { %v261_v35 = vadd.f32 %v255_v27, %v2480_v33 }
 0x14a   :  { %v133_v36 = vpop.f32.mrf.mxu0 }
 0x14b   :  { %v1873_v37 = vmul.f32 -1.442695, %v261_v35  ;;  %v2483_v38 = vadd.f32 %v1860_v31, %v133_v36 }
 0x14c   :  { %v2008_v39 = vpop.f32.mrf.mxu0 }
 0x14d   :  { %2228 = vpow2.f32 %v1873_v37 }
 0x14e   :  { %2230 = vtanh.f32 %v261_v35 }
 0x15a   :  { %v2229_v40 = vpop.eup %2228 }
 0x15b   :  { %v265_v41 = vadd.f32 1.0, %v2229_v40  ;;  %v2231_v43 = vpop.eup %2230 }
 0x15d   :  { %2232 = vrcp.f32 %v265_v41 }
 0x16a   :  { %v2233_v44 = vpop.eup %2232 }
 0x16b   :  { %v269_v45 = vsel %vm2485_vm7, %v2231_v43, %v2233_v44 }
 0x16c   :  { %276 = vrot.lane.b32.xlu1 %v269_v45, %s2366_s18 }
 0x170   :  { %271 = vrot.lane.b32.xlu1 %v142_v46, %s2367_s21 }
 0x1de   :  { %v277_v47 = vpop.permute.xlu1 %276 }
 0x1df   :  { %v279_v48 = vmul.f32 %v277_v47, %v269_v45 }
 0x1e1   :  { %281 = vrot.lane.b32.xlu0 %v279_v48, %s2367_s21 }
 0x1e2   :  { %v272_v49 = vpop.permute.xlu1 %271 }
 0x1e3   :  { %v274_v50 = vmul.f32 %v272_v49, %v269_v45 }
 0x253   :  { %v282_v51 = vpop.permute.xlu0 %281 }
 0x254   :  { %v2497_v52 = vadd.f32 %v282_v51, %v274_v50 }
 0x256   :  { %2234 = vtanh.f32 %v2497_v52  ;;  %v486_v36 = vrot.slane %v2497_v52, 6 }
 0x263   :  { %v2235_v55 = vpop.eup %2234 }
 0x264   :  { %287 = vrot.lane.b32.xlu1 %v2235_v55, %s2366_s18 }
 0x2d6   :  { %v288_v56 = vpop.permute.xlu1 %287 }
 0x2d7   :  { %v290_v57 = vmul.f32 %v288_v56, %v269_v45 }
 0x2d9   :  { %v291_v58 = vpack.c.bf16 %v290_v57, %v290_v57 }
 0x2db   :  { %293 = vrot.lane.b32.xlu0 %v291_v58, %s2367_s21 }
 0x34d   :  { %v294_v59 = vpop.permute.xlu0 %293 }
 0x34e   :  { %2030 = vmatmul.mubr.msk.bf16.vlgmr.msra.gmra.mxu0 %vm161_vm1, %v294_v59 }
 0x34f   :  { %2042 = vmatpush3.bf16.msra.mxu0 %v2437_v10  ;;  %2045 = vmatprep.mubr.msk.bf16.mxu0 %vm2365_vm0, %v2364_v3 }
 0x350   :  { %2043 = vmatprep.subr.bf16.mxu0 %v2364_v3 }
 0x353   :  { %2044 = vmatpush3.bf16.msra.mxu0 %v2447_v12 }
 0x354   :  { %2057 = vmatprep.subr.bf16.mxu0 %v2364_v3 }
 0x356   :  { %2046 = vmatmul.mubr.msk.bf16.vlgmr.msra.gmra.mxu0 %vm161_vm1, %v294_v59 }
 0x357   :  { %2058 = vmatpush3.bf16.msra.mxu0 %v2409_v4  ;;  %2061 = vmatprep.mubr.msk.bf16.mxu0 %vm2365_vm0, %v2364_v3 }
 0x358   :  { %2059 = vmatprep.subr.bf16.mxu0 %v2364_v3 }
 0x35b   :  { %2060 = vmatpush3.bf16.msra.mxu0 %v2423_v6 }
 0x35c   :  { %2073 = vmatprep.subr.bf16.mxu0 %v2364_v3 }
 0x40e   :  { %v344_v62 = vpop.f32.mrf.mxu0 }
 0x40f   :  { %v350_v63 = vadd.f32 %v344_v62, %v200_v61 }
 0x410   :  { %v2031_v0 = vpop.f32.mrf.mxu0 }
 0x411   :  { %v1877_v1 = vmul.f32 -1.442695, %v350_v63 }
 0x412   :  { %v347_v2 = vpop.f32.mrf.mxu0 }
 0x413   :  { %2236 = vpow2.f32 %v1877_v1 }
 0x414   :  { %v2032_v5 = vpop.f32.mrf.mxu0 }
 0x416   :  { %v467_v7 = vpop.f32.mrf.mxu0 }
 0x417   :  { %v474_v8 = vrot.slane %v467_v7, 6 }
 0x418   :  { %v2047_v9 = vpop.f32.mrf.mxu0 }
 0x419   :  { %v476_v11 = vadd.f32 %v474_v8, %v2480_v33 }
 0x41a   :  { %v470_v13 = vpop.f32.mrf.mxu0 }
 0x41b   :  { %v1880_v14 = vmul.f32 -1.442695, %v476_v11 }
 0x41c   :  { %v2048_v15 = vpop.f32.mrf.mxu0 }
 0x41d   :  { %2238 = vpow2.f32 %v1880_v14 }
 0x41e   :  { %2240 = vtanh.f32 %v350_v63 }
 0x420   :  { %v2237_v16 = vpop.eup %2236 }
 0x421   :  { %v354_v17 = vadd.f32 1.0, %v2237_v16 }
 0x423   :  { %2242 = vrcp.f32 %v354_v17 }
 0x424   :  { %2244 = vtanh.f32 %v476_v11 }
 0x42a   :  { %v2239_v18 = vpop.eup %2238 }
 0x42b   :  { %v480_v19 = vadd.f32 1.0, %v2239_v18  ;;  %v2241_v20 = vpop.eup %2240 }
 0x42d   :  { %2246 = vrcp.f32 %v480_v19 }
 0x430   :  { %v2243_v21 = vpop.eup %2242 }
 0x431   :  { %v358_v22 = vsel %vm2485_vm7, %v2241_v20, %v2243_v21  ;;  %v2245_v24 = vpop.eup %2244 }
 0x432   :  { %365 = vrot.lane.b32.xlu1 %v358_v22, %s2366_s18 }
 0x436   :  { %360 = vrot.lane.b32.xlu1 %v143_v23, %s2367_s21 }
 0x43a   :  { %v2247_v25 = vpop.eup %2246 }
 0x43b   :  { %v484_v26 = vsel %vm2485_vm7, %v2245_v24, %v2247_v25 }
 0x43c   :  { %490 = vrot.lane.b32.xlu0 %v484_v26, %s2366_s18  ;;  %v488_v37 = vmul.f32 %v486_v36, %v484_v26 }
 0x4a4   :  { %v366_v27 = vpop.permute.xlu1 %365 }
 0x4a5   :  { %v368_v28 = vmul.f32 %v366_v27, %v358_v22 }
 0x4a7   :  { %370 = vrot.lane.b32.xlu0 %v368_v28, %s2367_s21 }
 0x4a8   :  { %v361_v31 = vpop.permute.xlu1 %360 }
 0x4a9   :  { %v363_v32 = vmul.f32 %v361_v31, %v358_v22 }
 0x4ae   :  { %v491_v29 = vpop.permute.xlu0 %490 }
 0x4af   :  { %v493_v30 = vmul.f32 %v491_v29, %v484_v26 }
 0x4b1   :  { %495 = vrot.lane.b32.xlu1 %v493_v30, %s2367_s21 }
 0x519   :  { %v371_v34 = vpop.permute.xlu0 %370 }
 0x51a   :  { %v2550_v35 = vadd.f32 %v371_v34, %v363_v32 }
 0x51c   :  { %2248 = vtanh.f32 %v2550_v35 }
 0x523   :  { %v496_v39 = vpop.permute.xlu1 %495 }
 0x524   :  { %v2554_v40 = vadd.f32 %v496_v39, %v488_v37 }
 0x526   :  { %2250 = vtanh.f32 %v2554_v40  ;;  %v684_v32 = vrot.slane %v2554_v40, 6 }
 0x529   :  { %v2249_v41 = vpop.eup %2248 }
 0x52a   :  { %376 = vrot.lane.b32.xlu0 %v2249_v41, %s2366_s18 }
 0x533   :  { %v2251_v43 = vpop.eup %2250 }
 0x534   :  { %501 = vrot.lane.b32.xlu1 %v2251_v43, %s2366_s18 }
 0x59c   :  { %v377_v44 = vpop.permute.xlu0 %376 }
 0x59d   :  { %v2559_v45 = vmul.f32 %v377_v44, %v358_v22 }
 0x59f   :  { %v386_v46 = vpack.c.bf16 %v2559_v45, %v2559_v45 }
 0x5a1   :  { %388 = vrot.lane.b32.xlu0 %v386_v46, %s2367_s21 }
 0x5a6   :  { %v502_v47 = vpop.permute.xlu1 %501 }
 0x5a7   :  { %v504_v48 = vmul.f32 %v502_v47, %v484_v26 }
 0x5a9   :  { %v505_v49 = vpack.c.bf16 %v504_v48, %v504_v48 }
 0x5ab   :  { %v507_v50 = vrot.slane %v505_v49, 1 }
 0x5ad   :  { %508 = vrot.lane.b32.xlu1 %v507_v50, %s2367_s21 }
 0x613   :  { %v389_v51 = vpop.permute.xlu0 %388 }
 0x614   :  { %2038 = vmatmul.mubr.msk.bf16.vlgmr.msra.gmra.mxu1 %vm161_vm1, %v389_v51 }
 0x615   :  { %2050 = vmatpush3.bf16.msra.mxu1 %v2503_v53  ;;  %2053 = vmatprep.mubr.msk.bf16.mxu1 %vm2365_vm0, %v2364_v3 }
 0x616   :  { %2051 = vmatprep.subr.bf16.mxu1 %v2364_v3 }
 0x619   :  { %2052 = vmatpush3.bf16.msra.mxu1 %v2509_v54 }
 0x61a   :  { %2065 = vmatprep.subr.bf16.mxu1 %v2364_v3 }
 0x61f   :  { %v509_v52 = vpop.permute.xlu1 %508 }
 0x620   :  { %2054 = vmatmul.mubr.msk.bf16.vlgmr.msra.gmra.mxu1 %vm161_vm1, %v509_v52 }
 0x621   :  { %2066 = vmatpush3.bf16.msra.mxu1 %v2437_v10  ;;  %2069 = vmatprep.mubr.msk.bf16.mxu1 %vm2365_vm0, %v2364_v3 }
 0x622   :  { %2067 = vmatprep.subr.bf16.mxu1 %v2364_v3 }
 0x625   :  { %2068 = vmatpush3.bf16.msra.mxu1 %v2447_v12 }
 0x626   :  { %2081 = vmatprep.subr.bf16.mxu1 %v2364_v3 }
 0x628   :  { %2070 = vmatmul.mubr.msk.bf16.vlgmr.msra.gmra.mxu1 %vm161_vm1, %v509_v52 }
 0x629   :  { %2082 = vmatpush3.bf16.msra.mxu1 %v2409_v4  ;;  %2085 = vmatprep.mubr.msk.bf16.mxu1 %vm2365_vm0, %v2364_v3 }
 0x62a   :  { %2083 = vmatprep.subr.bf16.mxu1 %v2364_v3 }
 0x62d   :  { %2084 = vmatpush3.bf16.msra.mxu1 %v2423_v6 }
 0x62e   :  { %2097 = vmatprep.subr.bf16.mxu1 %v2364_v3 }
 0x6d4   :  { %v427_v55 = vpop.f32.mrf.mxu1 }
 0x6d5   :  { %v428_v59 = vadd.f32 %v2533_v60, %v427_v55 }
 0x6d6   :  { %v2039_v56 = vpop.f32.mrf.mxu1 }
 0x6d8   :  { %v430_v57 = vpop.f32.mrf.mxu1 }
 0x6da   :  { %v2040_v58 = vpop.f32.mrf.mxu1 }
 0x6e0   :  { %v547_v61 = vpop.f32.mrf.mxu1 }
 0x6e1   :  { %v553_v62 = vadd.f32 %v547_v61, %v428_v59 }
 0x6e2   :  { %v2055_v63 = vpop.f32.mrf.mxu1 }
 0x6e3   :  { %v1882_v0 = vmul.f32 -1.442695, %v553_v62 }
 0x6e4   :  { %v550_v1 = vpop.f32.mrf.mxu1 }
 0x6e5   :  { %2252 = vpow2.f32 %v1882_v0 }
 0x6e6   :  { %v2056_v2 = vpop.f32.mrf.mxu1 }
 0x6e8   :  { %v665_v5 = vpop.f32.mrf.mxu1 }
 0x6e9   :  { %v672_v7 = vrot.slane %v665_v5, 4 }
 0x6ea   :  { %v2071_v8 = vpop.f32.mrf.mxu1 }
 0x6eb   :  { %v674_v9 = vadd.f32 %v672_v7, %v2480_v33 }
 0x6ec   :  { %v668_v11 = vpop.f32.mrf.mxu1 }
 0x6ed   :  { %v1885_v13 = vmul.f32 -1.442695, %v674_v9 }
 0x6ee   :  { %v2072_v14 = vpop.f32.mrf.mxu1 }
 0x6ef   :  { %2254 = vpow2.f32 %v1885_v13 }
 0x6f0   :  { %2256 = vtanh.f32 %v553_v62 }
 0x6f2   :  { %v2253_v15 = vpop.eup %2252 }
 0x6f3   :  { %v557_v16 = vadd.f32 1.0, %v2253_v15 }
 0x6f5   :  { %2258 = vrcp.f32 %v557_v16 }
 0x6f6   :  { %2260 = vtanh.f32 %v674_v9 }
 0x6fc   :  { %v2255_v17 = vpop.eup %2254 }
 0x6fd   :  { %v678_v18 = vadd.f32 1.0, %v2255_v17  ;;  %v2257_v19 = vpop.eup %2256 }
 0x6ff   :  { %2262 = vrcp.f32 %v678_v18 }
 0x702   :  { %v2259_v20 = vpop.eup %2258 }
 0x703   :  { %v561_v21 = vsel %vm2485_vm7, %v2257_v19, %v2259_v20  ;;  %v2261_v22 = vpop.eup %2260 }
 0x704   :  { %564 = vrot.lane.b32.xlu0 %v561_v21, %s2366_s18  ;;  %v562_v29 = vmul.f32 %v561_v21, %v2550_v35 }
 0x70c   :  { %v2263_v23 = vpop.eup %2262 }
 0x70d   :  { %v682_v24 = vsel %vm2485_vm7, %v2261_v22, %v2263_v23 }
 0x70e   :  { %688 = vrot.lane.b32.xlu1 %v682_v24, %s2366_s18  ;;  %v686_v34 = vmul.f32 %v684_v32, %v682_v24 }
 0x776   :  { %v565_v25 = vpop.permute.xlu0 %564 }
 0x777   :  { %v567_v26 = vmul.f32 %v565_v25, %v561_v21 }
 0x779   :  { %569 = vrot.lane.b32.xlu0 %v567_v26, %s2367_s21 }
 0x780   :  { %v689_v27 = vpop.permute.xlu1 %688 }
 0x781   :  { %v691_v28 = vmul.f32 %v689_v27, %v682_v24 }
 0x783   :  { %693 = vrot.lane.b32.xlu1 %v691_v28, %s2367_s21 }
 0x7eb   :  { %v570_v30 = vpop.permute.xlu0 %569 }
 0x7ec   :  { %v2597_v31 = vadd.f32 %v570_v30, %v562_v29 }
 0x7ee   :  { %2264 = vtanh.f32 %v2597_v31 }
 0x7f5   :  { %v694_v36 = vpop.permute.xlu1 %693 }
 0x7f6   :  { %v2601_v37 = vadd.f32 %v694_v36, %v686_v34 }
 0x7f8   :  { %2266 = vtanh.f32 %v2601_v37  ;;  %v882_v29 = vrot.slane %v2601_v37, 6 }
 0x7fb   :  { %v2265_v39 = vpop.eup %2264 }
 0x7fc   :  { %575 = vrot.lane.b32.xlu0 %v2265_v39, %s2366_s18 }
 0x805   :  { %v2267_v41 = vpop.eup %2266 }
 0x806   :  { %699 = vrot.lane.b32.xlu1 %v2267_v41, %s2366_s18 }
 0x86e   :  { %v576_v35 = vpop.permute.xlu0 %575 }
 0x86f   :  { %v2606_v43 = vmul.f32 %v576_v35, %v561_v21 }
 0x871   :  { %v584_v44 = vpack.c.bf16 %v2606_v43, %v2606_v43 }
 0x873   :  { %586 = vrot.lane.b32.xlu0 %v584_v44, %s2367_s21 }
 0x878   :  { %v700_v40 = vpop.permute.xlu1 %699 }
 0x879   :  { %v702_v46 = vmul.f32 %v700_v40, %v682_v24 }
 0x87b   :  { %v703_v47 = vpack.c.bf16 %v702_v46, %v702_v46 }
 0x87d   :  { %v705_v48 = vrot.slane %v703_v47, 2 }
 0x87f   :  { %706 = vrot.lane.b32.xlu1 %v705_v48, %s2367_s21 }
 0x8e5   :  { %v587_v49 = vpop.permute.xlu0 %586 }
 0x8e6   :  { %2062 = vmatmul.mubr.msk.bf16.vlgmr.msra.gmra.mxu0 %vm161_vm1, %v587_v49 }
 0x8e7   :  { %2074 = vmatpush3.bf16.msra.mxu0 %v2503_v53  ;;  %2077 = vmatprep.mubr.msk.bf16.mxu0 %vm2365_vm0, %v2364_v3 }
 0x8e8   :  { %2075 = vmatprep.subr.bf16.mxu0 %v2364_v3 }
 0x8eb   :  { %2076 = vmatpush3.bf16.msra.mxu0 %v2509_v54 }
 0x8ec   :  { %2089 = vmatprep.subr.bf16.mxu0 %v2364_v3 }
 0x8f1   :  { %v707_v50 = vpop.permute.xlu1 %706 }
 0x8f2   :  { %2078 = vmatmul.mubr.msk.bf16.vlgmr.msra.gmra.mxu0 %vm161_vm1, %v707_v50 }
 0x8f3   :  { %2090 = vmatpush3.bf16.msra.mxu0 %v2437_v10  ;;  %2093 = vmatprep.mubr.msk.bf16.mxu0 %vm2365_vm0, %v2364_v3 }
 0x8f4   :  { %2091 = vmatprep.subr.bf16.mxu0 %v2364_v3 }
 0x8f7   :  { %2092 = vmatpush3.bf16.msra.mxu0 %v2447_v12 }
 0x8f8   :  { %2105 = vmatprep.subr.bf16.mxu0 %v2364_v3 }
 0x8fa   :  { %2094 = vmatmul.mubr.msk.bf16.vlgmr.msra.gmra.mxu0 %vm161_vm1, %v707_v50 }
 0x8fb   :  { %2106 = vmatpush3.bf16.msra.mxu0 %v2409_v4  ;;  %2109 = vmatprep.mubr.msk.bf16.mxu0 %vm2365_vm0, %v2364_v3 }
 0x8fc   :  { %2107 = vmatprep.subr.bf16.mxu0 %v2364_v3 }
 0x8ff   :  { %2108 = vmatpush3.bf16.msra.mxu0 %v2423_v6 }
 0x900   :  { %2121 = vmatprep.subr.bf16.mxu0 %v2364_v3 }
 0x9a6   :  { %v625_v51 = vpop.f32.mrf.mxu0 }
 0x9a7   :  { %v626_v57 = vadd.f32 %v2533_v60, %v625_v51 }
 0x9a8   :  { %v2063_v52 = vpop.f32.mrf.mxu0 }
 0x9aa   :  { %v628_v55 = vpop.f32.mrf.mxu0 }
 0x9ac   :  { %v2064_v56 = vpop.f32.mrf.mxu0 }
 0x9b2   :  { %v745_v58 = vpop.f32.mrf.mxu0 }
 0x9b3   :  { %v751_v59 = vadd.f32 %v745_v58, %v626_v57 }
 0x9b4   :  { %v2079_v61 = vpop.f32.mrf.mxu0 }
 0x9b5   :  { %v1887_v62 = vmul.f32 -1.442695, %v751_v59 }
 0x9b6   :  { %v748_v63 = vpop.f32.mrf.mxu0 }
 0x9b7   :  { %2268 = vpow2.f32 %v1887_v62 }
 0x9b8   :  { %v2080_v0 = vpop.f32.mrf.mxu0 }
 0x9ba   :  { %v863_v1 = vpop.f32.mrf.mxu0 }
 0x9bb   :  { %v870_v2 = vrot.slane %v863_v1, 2 }
 0x9bc   :  { %v2095_v5 = vpop.f32.mrf.mxu0 }
 0x9bd   :  { %v872_v7 = vadd.f32 %v870_v2, %v2480_v33 }
 0x9be   :  { %v866_v8 = vpop.f32.mrf.mxu0 }
 0x9bf   :  { %v1890_v9 = vmul.f32 -1.442695, %v872_v7 }
 0x9c0   :  { %v2096_v11 = vpop.f32.mrf.mxu0 }
 0x9c1   :  { %2270 = vpow2.f32 %v1890_v9 }
 0x9c2   :  { %2272 = vtanh.f32 %v751_v59 }
 0x9c4   :  { %v2269_v13 = vpop.eup %2268 }
 0x9c5   :  { %v755_v14 = vadd.f32 1.0, %v2269_v13 }
 0x9c7   :  { %2274 = vrcp.f32 %v755_v14 }
 0x9c8   :  { %2276 = vtanh.f32 %v872_v7 }
 0x9ce   :  { %v2271_v15 = vpop.eup %2270 }
 0x9cf   :  { %v876_v16 = vadd.f32 1.0, %v2271_v15  ;;  %v2273_v17 = vpop.eup %2272 }
 0x9d1   :  { %2278 = vrcp.f32 %v876_v16 }
 0x9d4   :  { %v2275_v18 = vpop.eup %2274 }
 0x9d5   :  { %v759_v19 = vsel %vm2485_vm7, %v2273_v17, %v2275_v18  ;;  %v2277_v33 = vpop.eup %2276 }
 0x9d6   :  { %762 = vrot.lane.b32.xlu0 %v759_v19, %s2366_s18  ;;  %v760_v26 = vmul.f32 %v759_v19, %v2597_v31 }
 0x9de   :  { %v2279_v20 = vpop.eup %2278 }
 0x9df   :  { %v880_v21 = vsel %vm2485_vm7, %v2277_v33, %v2279_v20 }
 0x9e0   :  { %886 = vrot.lane.b32.xlu1 %v880_v21, %s2366_s18  ;;  %v884_v30 = vmul.f32 %v882_v29, %v880_v21 }
 0xa48   :  { %v763_v22 = vpop.permute.xlu0 %762 }
 0xa49   :  { %v765_v23 = vmul.f32 %v763_v22, %v759_v19 }
 0xa4b   :  { %767 = vrot.lane.b32.xlu0 %v765_v23, %s2367_s21 }
 0xa52   :  { %v887_v24 = vpop.permute.xlu1 %886 }
 0xa53   :  { %v889_v25 = vmul.f32 %v887_v24, %v880_v21 }
 0xa55   :  { %891 = vrot.lane.b32.xlu1 %v889_v25, %s2367_s21 }
 0xabd   :  { %v768_v27 = vpop.permute.xlu0 %767 }
 0xabe   :  { %v2644_v28 = vadd.f32 %v768_v27, %v760_v26 }
 0xac0   :  { %2280 = vtanh.f32 %v2644_v28 }
 0xac7   :  { %v892_v32 = vpop.permute.xlu1 %891 }
 0xac8   :  { %v2648_v34 = vadd.f32 %v892_v32, %v884_v30 }
 0xaca   :  { %2282 = vtanh.f32 %v2648_v34  ;;  %v1077_v26 = vrot.slane %v2648_v34, 6 }
 0xacd   :  { %v2281_v36 = vpop.eup %2280 }
 0xace   :  { %773 = vrot.lane.b32.xlu0 %v2281_v36, %s2366_s18 }
 0xad7   :  { %v2283_v39 = vpop.eup %2282 }
 0xad8   :  { %897 = vrot.lane.b32.xlu1 %v2283_v39, %s2366_s18 }
 0xb40   :  { %v774_v31 = vpop.permute.xlu0 %773 }
 0xb41   :  { %v2653_v41 = vmul.f32 %v774_v31, %v759_v19 }
 0xb43   :  { %v782_v35 = vpack.c.bf16 %v2653_v41, %v2653_v41 }
 0xb45   :  { %784 = vrot.lane.b32.xlu0 %v782_v35, %s2367_s21 }
 0xb4a   :  { %v898_v37 = vpop.permute.xlu1 %897 }
 0xb4b   :  { %v900_v44 = vmul.f32 %v898_v37, %v880_v21 }
 0xb4d   :  { %v901_v40 = vpack.c.bf16 %v900_v44, %v900_v44 }
 0xb4f   :  { %v903_v46 = vrot.slane %v901_v40, 3 }
 0xb51   :  { %904 = vrot.lane.b32.xlu1 %v903_v46, %s2367_s21 }
 0xbb7   :  { %v785_v47 = vpop.permute.xlu0 %784 }
 0xbb8   :  { %2086 = vmatmul.mubr.msk.bf16.vlgmr.msra.gmra.mxu1 %vm161_vm1, %v785_v47 }
 0xbb9   :  { %2098 = vmatpush3.bf16.msra.mxu1 %v2503_v53  ;;  %2101 = vmatprep.mubr.msk.bf16.mxu1 %vm2365_vm0, %v2364_v3 }
 0xbba   :  { %2099 = vmatprep.subr.bf16.mxu1 %v2364_v3 }
 0xbbd   :  { %2100 = vmatpush3.bf16.msra.mxu1 %v2509_v54 }
 0xbbe   :  { %2113 = vmatprep.subr.bf16.mxu1 %v2364_v3 }
 0xbc3   :  { %v905_v48 = vpop.permute.xlu1 %904 }
 0xbc4   :  { %2102 = vmatmul.mubr.msk.bf16.vlgmr.msra.gmra.mxu1 %vm161_vm1, %v905_v48 }
 0xbc5   :  { %2114 = vmatpush3.bf16.msra.mxu1 %v2437_v10  ;;  %2117 = vmatprep.mubr.msk.bf16.mxu1 %vm2365_vm0, %v2364_v3 }
 0xbc6   :  { %2115 = vmatprep.subr.bf16.mxu1 %v2364_v3 }
 0xbc9   :  { %2116 = vmatpush3.bf16.msra.mxu1 %v2447_v12 }
 0xbca   :  { %2129 = vmatprep.subr.bf16.mxu1 %v2364_v3 }
 0xbcc   :  { %2118 = vmatmul.mubr.msk.bf16.vlgmr.msra.gmra.mxu1 %vm161_vm1, %v905_v48 }
 0xbcd   :  { %2130 = vmatpush3.bf16.msra.mxu1 %v2409_v4  ;;  %2133 = vmatprep.mubr.msk.bf16.mxu1 %vm2365_vm0, %v2364_v3 }
 0xbce   :  { %2131 = vmatprep.subr.bf16.mxu1 %v2364_v3 }
 0xbd1   :  { %2132 = vmatpush3.bf16.msra.mxu1 %v2423_v6 }
 0xbd2   :  { %2145 = vmatprep.subr.bf16.mxu1 %v2364_v3 }
 0xc78   :  { %v823_v49 = vpop.f32.mrf.mxu1 }
 0xc79   :  { %v824_v55 = vadd.f32 %v2533_v60, %v823_v49 }
 0xc7a   :  { %v2087_v50 = vpop.f32.mrf.mxu1 }
 0xc7c   :  { %v826_v51 = vpop.f32.mrf.mxu1 }
 0xc7e   :  { %v2088_v52 = vpop.f32.mrf.mxu1 }
 0xc84   :  { %v943_v56 = vpop.f32.mrf.mxu1 }
 0xc85   :  { %v949_v57 = vadd.f32 %v943_v56, %v824_v55 }
 0xc86   :  { %v2103_v58 = vpop.f32.mrf.mxu1 }
 0xc87   :  { %v1892_v59 = vmul.f32 -1.442695, %v949_v57 }
 0xc88   :  { %v946_v61 = vpop.f32.mrf.mxu1 }
 0xc89   :  { %2284 = vpow2.f32 %v1892_v59 }
 0xc8a   :  { %v2104_v62 = vpop.f32.mrf.mxu1 }
 0xc8c   :  { %v1061_v63 = vpop.f32.mrf.mxu1 }
 0xc8d   :  { %v1067_v0 = vadd.f32 %v1061_v63, %v2483_v38 }
 0xc8e   :  { %v2119_v1 = vpop.f32.mrf.mxu1 }
 0xc8f   :  { %v1895_v2 = vmul.f32 -1.442695, %v1067_v0 }
 0xc90   :  { %v1064_v5 = vpop.f32.mrf.mxu1 }
 0xc91   :  { %2286 = vpow2.f32 %v1895_v2 }
 0xc92   :  { %v2120_v7 = vpop.f32.mrf.mxu1  ;;  %2288 = vtanh.f32 %v949_v57 }
 0xc96   :  { %v2285_v8 = vpop.eup %2284 }
 0xc97   :  { %v953_v9 = vadd.f32 1.0, %v2285_v8 }
 0xc99   :  { %2290 = vrcp.f32 %v953_v9 }
 0xc9a   :  { %2292 = vtanh.f32 %v1067_v0 }
 0xc9e   :  { %v2287_v11 = vpop.eup %2286 }
 0xc9f   :  { %v1071_v13 = vadd.f32 1.0, %v2287_v11  ;;  %v2289_v14 = vpop.eup %2288 }
 0xca1   :  { %2294 = vrcp.f32 %v1071_v13 }
 0xca6   :  { %v2291_v15 = vpop.eup %2290 }
 0xca7   :  { %v957_v16 = vsel %vm2485_vm7, %v2289_v14, %v2291_v15  ;;  %v2293_v17 = vpop.eup %2292 }
 0xca8   :  { %960 = vrot.lane.b32.xlu0 %v957_v16, %s2366_s18  ;;  %v958_v23 = vmul.f32 %v957_v16, %v2644_v28 }
 0xcae   :  { %v2295_v18 = vpop.eup %2294 }
 0xcaf   :  { %v1075_v19 = vsel %vm2485_vm7, %v2293_v17, %v2295_v18 }
 0xcb0   :  { %1081 = vrot.lane.b32.xlu1 %v1075_v19, %s2366_s18  ;;  %v1079_v27 = vmul.f32 %v1077_v26, %v1075_v19 }
 0xd1a   :  { %v961_v33 = vpop.permute.xlu0 %960 }
 0xd1b   :  { %v963_v20 = vmul.f32 %v961_v33, %v957_v16 }
 0xd1d   :  { %965 = vrot.lane.b32.xlu0 %v963_v20, %s2367_s21 }
 0xd22   :  { %v1082_v21 = vpop.permute.xlu1 %1081 }
 0xd23   :  { %v1084_v22 = vmul.f32 %v1082_v21, %v1075_v19 }
 0xd25   :  { %1086 = vrot.lane.b32.xlu1 %v1084_v22, %s2367_s21 }
 0xd8f   :  { %v966_v24 = vpop.permute.xlu0 %965 }
 0xd90   :  { %v2691_v25 = vadd.f32 %v966_v24, %v958_v23 }
 0xd92   :  { %2296 = vtanh.f32 %v2691_v25 }
 0xd97   :  { %v1087_v29 = vpop.permute.xlu1 %1086 }
 0xd98   :  { %v2695_v30 = vadd.f32 %v1087_v29, %v1079_v27 }
 0xd9a   :  { %2298 = vtanh.f32 %v2695_v30  ;;  %v1274_v20 = vrot.slane %v2695_v30, 6 }
 0xd9f   :  { %v2297_v32 = vpop.eup %2296 }
 0xda0   :  { %971 = vrot.lane.b32.xlu0 %v2297_v32, %s2366_s18 }
 0xda7   :  { %v2299_v36 = vpop.eup %2298 }
 0xda8   :  { %1092 = vrot.lane.b32.xlu1 %v2299_v36, %s2366_s18 }
 0xe12   :  { %v972_v28 = vpop.permute.xlu0 %971 }
 0xe13   :  { %v2700_v39 = vmul.f32 %v972_v28, %v957_v16 }
 0xe15   :  { %v980_v31 = vpack.c.bf16 %v2700_v39, %v2700_v39 }
 0xe17   :  { %982 = vrot.lane.b32.xlu0 %v980_v31, %s2367_s21 }
 0xe1a   :  { %v1093_v34 = vpop.permute.xlu1 %1092 }
 0xe1b   :  { %v1095_v35 = vmul.f32 %v1093_v34, %v1075_v19 }
 0xe1d   :  { %v1096_v37 = vpack.c.bf16 %v1095_v35, %v1095_v35  ;;  %v2764_v35 = vld [vmem:[%s2929_s1 + $0x28] sm:$0xff]  }
 0xe1f   :  { %1098 = vrot.lane.b32.xlu1 %v1096_v37, %s2367_s21  ;;  %v2773_v37 = vld [vmem:[%s2929_s1 + $0x20] sm:$0xff]  }
 0xe89   :  { %v983_v44 = vpop.permute.xlu0 %982 }
 0xe8a   :  { %2110 = vmatmul.mubr.msk.bf16.vlgmr.msra.gmra.mxu0 %vm161_vm1, %v983_v44  ;;  %v2358_v44 = vld [vmem:[%s2929_s1 + $0x48] sm:$0xff]  }
 0xe8b   :  { %2122 = vmatpush3.bf16.msra.mxu0 %v2503_v53  ;;  %2125 = vmatprep.mubr.msk.bf16.mxu0 %vm2365_vm0, %v2364_v3 }
 0xe8c   :  { %2123 = vmatprep.subr.bf16.mxu0 %v2364_v3 }
 0xe8f   :  { %2124 = vmatpush3.bf16.msra.mxu0 %v2509_v54 }
 0xe90   :  { %2137 = vmatprep.subr.bf16.mxu0 %v2364_v3 }
 0xe91   :  { %v1099_v40 = vpop.permute.xlu1 %1098 }
 0xe92   :  { %2126 = vmatmul.mubr.msk.bf16.vlgmr.msra.gmra.mxu0 %vm161_vm1, %v1099_v40 }
 0xe93   :  { %2138 = vmatpush3.bf16.msra.mxu0 %v2437_v10  ;;  %2141 = vmatprep.mubr.msk.bf16.mxu0 %vm2365_vm0, %v2364_v3 }
 0xe94   :  { %2139 = vmatprep.subr.bf16.mxu0 %v2364_v3 }
 0xe97   :  { %2140 = vmatpush3.bf16.msra.mxu0 %v2447_v12 }
 0xe98   :  { %2153 = vmatprep.subr.bf16.mxu0 %v2364_v3 }
 0xe9a   :  { %2142 = vmatmul.mubr.msk.bf16.vlgmr.msra.gmra.mxu0 %vm161_vm1, %v1099_v40  ;;  %v2359_v40 = vld [vmem:[%s2929_s1 + $0x40] sm:$0xff]  }
 0xe9b   :  { %2154 = vmatpush3.bf16.msra.mxu0 %v2409_v4  ;;  %2157 = vmatprep.mubr.msk.bf16.mxu0 %vm2365_vm0, %v2364_v3 }
 0xe9c   :  { %2155 = vmatprep.subr.bf16.mxu0 %v2364_v3 }
 0xe9f   :  { %2156 = vmatpush3.bf16.msra.mxu0 %v2423_v6 }
 0xea0   :  { %2169 = vmatprep.subr.bf16.mxu0 %v2364_v3 }
 0xf4a   :  { %v1021_v10 = vpop.f32.mrf.mxu0 }
 0xf4b   :  { %v1022_v12 = vadd.f32 %v2533_v60, %v1021_v10 }
 0xf4c   :  { %v2111_v46 = vpop.f32.mrf.mxu0 }
 0xf4e   :  { %v1024_v47 = vpop.f32.mrf.mxu0 }
 0xf50   :  { %v2112_v48 = vpop.f32.mrf.mxu0 }
 0xf52   :  { %v1137_v49 = vpop.f32.mrf.mxu0 }
 0xf53   :  { %v1143_v50 = vadd.f32 %v1137_v49, %v1022_v12 }
 0xf54   :  { %v2127_v51 = vpop.f32.mrf.mxu0 }
 0xf55   :  { %v1897_v52 = vmul.f32 -1.442695, %v1143_v50 }
 0xf56   :  { %v1140_v4 = vpop.f32.mrf.mxu0 }
 0xf57   :  { %2300 = vpow2.f32 %v1897_v52 }
 0xf58   :  { %v2128_v55 = vpop.f32.mrf.mxu0 }
 0xf5a   :  { %v1255_v56 = vpop.f32.mrf.mxu0 }
 0xf5b   :  { %v1262_v57 = vrot.slane %v1255_v56, 6 }
 0xf5c   :  { %v2143_v58 = vpop.f32.mrf.mxu0 }
 0xf5d   :  { %v1264_v6 = vadd.f32 %v1262_v57, %v2483_v38 }
 0xf5e   :  { %v1258_v59 = vpop.f32.mrf.mxu0 }
 0xf5f   :  { %v1900_v61 = vmul.f32 -1.442695, %v1264_v6 }
 0xf60   :  { %v2144_v62 = vpop.f32.mrf.mxu0 }
 0xf61   :  { %2302 = vpow2.f32 %v1900_v61 }
 0xf62   :  { %2304 = vtanh.f32 %v1143_v50 }
 0xf64   :  { %v2301_v63 = vpop.eup %2300 }
 0xf65   :  { %v1147_v0 = vadd.f32 1.0, %v2301_v63 }
 0xf67   :  { %2306 = vrcp.f32 %v1147_v0 }
 0xf68   :  { %2308 = vtanh.f32 %v1264_v6 }
 0xf6e   :  { %v2303_v1 = vpop.eup %2302 }
 0xf6f   :  { %v1268_v2 = vadd.f32 1.0, %v2303_v1  ;;  %v2305_v5 = vpop.eup %2304 }
 0xf71   :  { %2310 = vrcp.f32 %v1268_v2 }
 0xf74   :  { %v2307_v7 = vpop.eup %2306 }
 0xf75   :  { %v1151_v8 = vsel %vm2485_vm7, %v2305_v5, %v2307_v7  ;;  %v2309_v9 = vpop.eup %2308 }
 0xf76   :  { %1154 = vrot.lane.b32.xlu0 %v1151_v8, %s2366_s18  ;;  %v1152_v18 = vmul.f32 %v1151_v8, %v2691_v25 }
 0xf7e   :  { %v2311_v11 = vpop.eup %2310 }
 0xf7f   :  { %v1272_v13 = vsel %vm2485_vm7, %v2309_v9, %v2311_v11 }
 0xf80   :  { %1278 = vrot.lane.b32.xlu1 %v1272_v13, %s2366_s18  ;;  %v1276_v21 = vmul.f32 %v1274_v20, %v1272_v13 }
 0xfe8   :  { %v1155_v14 = vpop.permute.xlu0 %1154 }
 0xfe9   :  { %v1157_v15 = vmul.f32 %v1155_v14, %v1151_v8 }
 0xfeb   :  { %1159 = vrot.lane.b32.xlu0 %v1157_v15, %s2367_s21 }
 0xff2   :  { %v1279_v16 = vpop.permute.xlu1 %1278 }
 0xff3   :  { %v1281_v17 = vmul.f32 %v1279_v16, %v1272_v13 }
 0xff5   :  { %1283 = vrot.lane.b32.xlu1 %v1281_v17, %s2367_s21 }
0x105d   :  { %v1160_v19 = vpop.permute.xlu0 %1159 }
0x105e   :  { %v2738_v33 = vadd.f32 %v1160_v19, %v1152_v18 }
0x1060   :  { %2312 = vtanh.f32 %v2738_v33 }
0x1067   :  { %v1284_v22 = vpop.permute.xlu1 %1283 }
0x1068   :  { %v2742_v23 = vadd.f32 %v1284_v22, %v1276_v21 }
0x106a   :  { %2314 = vtanh.f32 %v2742_v23  ;;  %v1472_v21 = vrot.slane %v2742_v23, 6 }
0x106d   :  { %v2313_v24 = vpop.eup %2312 }
0x106e   :  { %1165 = vrot.lane.b32.xlu0 %v2313_v24, %s2366_s18 }
0x1077   :  { %v2315_v26 = vpop.eup %2314 }
0x1078   :  { %1289 = vrot.lane.b32.xlu1 %v2315_v26, %s2366_s18 }
0x10e0   :  { %v1166_v25 = vpop.permute.xlu0 %1165 }
0x10e1   :  { %v2747_v27 = vmul.f32 %v1166_v25, %v1151_v8 }
0x10e3   :  { %v1174_v29 = vpack.c.bf16 %v2747_v27, %v2747_v27 }
0x10e5   :  { %1176 = vrot.lane.b32.xlu0 %v1174_v29, %s2367_s21 }
0x10ea   :  { %v1290_v30 = vpop.permute.xlu1 %1289 }
0x10eb   :  { %v1292_v32 = vmul.f32 %v1290_v30, %v1272_v13 }
0x10ed   :  { %v1293_v36 = vpack.c.bf16 %v1292_v32, %v1292_v32 }
0x10ef   :  { %v1295_v28 = vrot.slane %v1293_v36, 1 }
0x10f1   :  { %1296 = vrot.lane.b32.xlu1 %v1295_v28, %s2367_s21 }
0x1157   :  { %v1177_v31 = vpop.permute.xlu0 %1176 }
0x1158   :  { %2134 = vmatmul.mubr.msk.bf16.vlgmr.msra.gmra.mxu1 %vm161_vm1, %v1177_v31 }
0x1159   :  { %2146 = vmatpush3.bf16.msra.mxu1 %v2503_v53  ;;  %2149 = vmatprep.mubr.msk.bf16.mxu1 %vm2365_vm0, %v2364_v3 }
0x115a   :  { %2147 = vmatprep.subr.bf16.mxu1 %v2364_v3 }
0x115d   :  { %2148 = vmatpush3.bf16.msra.mxu1 %v2509_v54 }
0x115e   :  { %2161 = vmatprep.subr.bf16.mxu1 %v2364_v3 }
0x1163   :  { %v1297_v34 = vpop.permute.xlu1 %1296 }
0x1164   :  { %2150 = vmatmul.mubr.msk.bf16.vlgmr.msra.gmra.mxu1 %vm161_vm1, %v1297_v34 }
0x1165   :  { %2162 = vmatpush3.bf16.msra.mxu1 %v2764_v35  ;;  %2165 = vmatprep.mubr.msk.bf16.mxu1 %vm2365_vm0, %v2364_v3 }
0x1166   :  { %2163 = vmatprep.subr.bf16.mxu1 %v2364_v3 }
0x1169   :  { %2164 = vmatpush3.bf16.msra.mxu1 %v2773_v37 }
0x116a   :  { %2177 = vmatprep.subr.bf16.mxu1 %v2364_v3 }
0x116c   :  { %2166 = vmatmul.mubr.msk.bf16.vlgmr.msra.gmra.mxu1 %vm161_vm1, %v1297_v34 }
0x116d   :  { %2178 = vmatpush3.bf16.msra.mxu1 %v2358_v44  ;;  %2181 = vmatprep.mubr.msk.bf16.mxu1 %vm2365_vm0, %v2364_v3 }
0x116e   :  { %2179 = vmatprep.subr.bf16.mxu1 %v2364_v3 }
0x1171   :  { %2180 = vmatpush3.bf16.msra.mxu1 %v2359_v40 }
0x1172   :  { %2193 = vmatprep.subr.bf16.mxu1 %v2364_v3 }
0x1218   :  { %v1215_v10 = vpop.f32.mrf.mxu1 }
0x1219   :  { %v1216_v12 = vadd.f32 %v2533_v60, %v1215_v10 }
0x121a   :  { %v2135_v46 = vpop.f32.mrf.mxu1 }
0x121c   :  { %v1218_v47 = vpop.f32.mrf.mxu1 }
0x121e   :  { %v2136_v48 = vpop.f32.mrf.mxu1 }
0x1224   :  { %v1335_v49 = vpop.f32.mrf.mxu1 }
0x1225   :  { %v1341_v50 = vadd.f32 %v1335_v49, %v1216_v12 }
0x1226   :  { %v2151_v51 = vpop.f32.mrf.mxu1 }
0x1227   :  { %v1902_v52 = vmul.f32 -1.442695, %v1341_v50 }
0x1228   :  { %v1338_v4 = vpop.f32.mrf.mxu1 }
0x1229   :  { %2316 = vpow2.f32 %v1902_v52 }
0x122a   :  { %v2152_v55 = vpop.f32.mrf.mxu1 }
0x122c   :  { %v1453_v56 = vpop.f32.mrf.mxu1 }
0x122d   :  { %v1460_v57 = vrot.slane %v1453_v56, 4 }
0x122e   :  { %v2167_v58 = vpop.f32.mrf.mxu1 }
0x122f   :  { %v1462_v6 = vadd.f32 %v1460_v57, %v2483_v38 }
0x1230   :  { %v1456_v59 = vpop.f32.mrf.mxu1 }
0x1231   :  { %v1905_v61 = vmul.f32 -1.442695, %v1462_v6 }
0x1232   :  { %v2168_v62 = vpop.f32.mrf.mxu1 }
0x1233   :  { %2318 = vpow2.f32 %v1905_v61 }
0x1234   :  { %2320 = vtanh.f32 %v1341_v50 }
0x1236   :  { %v2317_v63 = vpop.eup %2316 }
0x1237   :  { %v1345_v0 = vadd.f32 1.0, %v2317_v63 }
0x1239   :  { %2322 = vrcp.f32 %v1345_v0 }
0x123a   :  { %2324 = vtanh.f32 %v1462_v6 }
0x1240   :  { %v2319_v1 = vpop.eup %2318 }
0x1241   :  { %v1466_v2 = vadd.f32 1.0, %v2319_v1  ;;  %v2321_v5 = vpop.eup %2320 }
0x1243   :  { %2326 = vrcp.f32 %v1466_v2 }
0x1246   :  { %v2323_v7 = vpop.eup %2322 }
0x1247   :  { %v1349_v8 = vsel %vm2485_vm7, %v2321_v5, %v2323_v7  ;;  %v2325_v9 = vpop.eup %2324 }
0x1248   :  { %1352 = vrot.lane.b32.xlu0 %v1349_v8, %s2366_s18  ;;  %v1350_v18 = vmul.f32 %v1349_v8, %v2738_v33 }
0x1250   :  { %v2327_v11 = vpop.eup %2326 }
0x1251   :  { %v1470_v13 = vsel %vm2485_vm7, %v2325_v9, %v2327_v11 }
0x1252   :  { %1476 = vrot.lane.b32.xlu1 %v1470_v13, %s2366_s18  ;;  %v1474_v22 = vmul.f32 %v1472_v21, %v1470_v13 }
0x12ba   :  { %v1353_v14 = vpop.permute.xlu0 %1352 }
0x12bb   :  { %v1355_v15 = vmul.f32 %v1353_v14, %v1349_v8 }
0x12bd   :  { %1357 = vrot.lane.b32.xlu0 %v1355_v15, %s2367_s21 }
0x12c4   :  { %v1477_v16 = vpop.permute.xlu1 %1476 }
0x12c5   :  { %v1479_v17 = vmul.f32 %v1477_v16, %v1470_v13 }
0x12c7   :  { %1481 = vrot.lane.b32.xlu1 %v1479_v17, %s2367_s21 }
0x132f   :  { %v1358_v19 = vpop.permute.xlu0 %1357 }
0x1330   :  { %v2799_v20 = vadd.f32 %v1358_v19, %v1350_v18 }
0x1332   :  { %2328 = vtanh.f32 %v2799_v20 }
0x1339   :  { %v1482_v24 = vpop.permute.xlu1 %1481 }
0x133a   :  { %v2803_v26 = vadd.f32 %v1482_v24, %v1474_v22 }
0x133c   :  { %2330 = vtanh.f32 %v2803_v26  ;;  %v1670_v14 = vrot.slane %v2803_v26, 6 }
0x133f   :  { %v2329_v25 = vpop.eup %2328 }
0x1340   :  { %1363 = vrot.lane.b32.xlu0 %v2329_v25, %s2366_s18 }
0x1349   :  { %v2331_v29 = vpop.eup %2330 }
0x134a   :  { %1487 = vrot.lane.b32.xlu1 %v2331_v29, %s2366_s18 }
0x13b2   :  { %v1364_v33 = vpop.permute.xlu0 %1363 }
0x13b3   :  { %v2808_v30 = vmul.f32 %v1364_v33, %v1349_v8 }
0x13b5   :  { %v1372_v32 = vpack.c.bf16 %v2808_v30, %v2808_v30 }
0x13b7   :  { %1374 = vrot.lane.b32.xlu0 %v1372_v32, %s2367_s21  ;;  %v2360_v32 = vld [vmem:[%s2929_s1 + $0x38] sm:$0xff]  }
0x13bc   :  { %v1488_v23 = vpop.permute.xlu1 %1487 }
0x13bd   :  { %v1490_v36 = vmul.f32 %v1488_v23, %v1470_v13  ;;  %v2361_v23 = vld [vmem:[%s2929_s1 + $0x30] sm:$0xff]  }
0x13bf   :  { %v1491_v28 = vpack.c.bf16 %v1490_v36, %v1490_v36 }
0x13c1   :  { %v1493_v31 = vrot.slane %v1491_v28, 2 }
0x13c3   :  { %1494 = vrot.lane.b32.xlu1 %v1493_v31, %s2367_s21 }
0x1429   :  { %v1375_v34 = vpop.permute.xlu0 %1374 }
0x142a   :  { %2158 = vmatmul.mubr.msk.bf16.vlgmr.msra.gmra.mxu0 %vm161_vm1, %v1375_v34 }
0x142b   :  { %2170 = vmatpush3.bf16.msra.mxu0 %v2503_v53  ;;  %2173 = vmatprep.mubr.msk.bf16.mxu0 %vm2365_vm0, %v2364_v3 }
0x142c   :  { %2171 = vmatprep.subr.bf16.mxu0 %v2364_v3 }
0x142f   :  { %2172 = vmatpush3.bf16.msra.mxu0 %v2509_v54 }
0x1430   :  { %2185 = vmatprep.subr.bf16.mxu0 %v2364_v3 }
0x1435   :  { %v1495_v44 = vpop.permute.xlu1 %1494 }
0x1436   :  { %2174 = vmatmul.mubr.msk.bf16.vlgmr.msra.gmra.mxu0 %vm161_vm1, %v1495_v44 }
0x1437   :  { %2186 = vmatpush3.bf16.msra.mxu0 %v2764_v35  ;;  %2189 = vmatprep.mubr.msk.bf16.mxu0 %vm2365_vm0, %v2364_v3 }
0x1438   :  { %2187 = vmatprep.subr.bf16.mxu0 %v2364_v3 }
0x143b   :  { %2188 = vmatpush3.bf16.msra.mxu0 %v2773_v37 }
0x143c   :  { %2201 = vmatprep.subr.bf16.mxu0 %v2364_v3 }
0x143e   :  { %2190 = vmatmul.mubr.msk.bf16.vlgmr.msra.gmra.mxu0 %vm161_vm1, %v1495_v44 }
0x143f   :  { %2205 = vmatprep.mubr.msk.bf16.mxu0 %vm2365_vm0, %v2364_v3 }
0x14ea   :  { %v1413_v53 = vpop.f32.mrf.mxu0 }
0x14eb   :  { %v1414_v35 = vadd.f32 %v2533_v60, %v1413_v53  ;;  %v2362_v53 = vld [vmem:[%s2931_s2 + $0x1] ss:$0 sm:$0xff] }
0x14ec   :  { %v2159_v54 = vpop.f32.mrf.mxu0 }
0x14ee   :  { %v1416_v40 = vpop.f32.mrf.mxu0 }
0x14f0   :  { %v2160_v10 = vpop.f32.mrf.mxu0 }
0x14f6   :  { %v1533_v46 = vpop.f32.mrf.mxu0 }
0x14f7   :  { %v1539_v47 = vadd.f32 %v1533_v46, %v1414_v35 }
0x14f8   :  { %v2175_v48 = vpop.f32.mrf.mxu0 }
0x14f9   :  { %v1907_v12 = vmul.f32 -1.442695, %v1539_v47 }
0x14fa   :  { %v1536_v49 = vpop.f32.mrf.mxu0 }
0x14fb   :  { %2332 = vpow2.f32 %v1907_v12 }
0x14fc   :  { %v2176_v37 = vpop.f32.mrf.mxu0 }
0x14fe   :  { %v1651_v50 = vpop.f32.mrf.mxu0 }
0x14ff   :  { %v1658_v51 = vrot.slane %v1651_v50, 2 }
0x1500   :  { %v2191_v52 = vpop.f32.mrf.mxu0 }
0x1501   :  { %v1660_v4 = vadd.f32 %v1658_v51, %v2483_v38 }
0x1502   :  { %v1654_v55 = vpop.f32.mrf.mxu0 }
0x1503   :  { %v1910_v56 = vmul.f32 -1.442695, %v1660_v4 }
0x1504   :  { %v2192_v57 = vpop.f32.mrf.mxu0 }
0x1505   :  { %2334 = vpow2.f32 %v1910_v56 }
0x1506   :  { %2336 = vtanh.f32 %v1539_v47 }
0x1508   :  { %v2333_v58 = vpop.eup %2332 }
0x1509   :  { %v1543_v6 = vadd.f32 1.0, %v2333_v58 }
0x150b   :  { %2338 = vrcp.f32 %v1543_v6 }
0x150c   :  { %2340 = vtanh.f32 %v1660_v4 }
0x1512   :  { %v2335_v60 = vpop.eup %2334 }
0x1513   :  { %v1664_v59 = vadd.f32 1.0, %v2335_v60  ;;  %v2337_v61 = vpop.eup %2336 }
0x1515   :  { %2342 = vrcp.f32 %v1664_v59  ;;  %v2226_v59 = vld [vmem:[%s2929_s1 + $0x58] sm:$0xff]  }
0x1516   :  { %2202 = vmatpush3.bf16.msra.mxu0 %v2226_v59 }
0x1517   :  { %2203 = vmatprep.subr.bf16.mxu0 %v2364_v3 }
0x1518   :  { %v2339_v62 = vpop.eup %2338 }
0x1519   :  { %v1547_v63 = vsel %vm2485_vm7, %v2337_v61, %v2339_v62  ;;  %v2341_v38 = vpop.eup %2340 }
0x151a   :  { %1550 = vrot.lane.b32.xlu0 %v1547_v63, %s2366_s18  ;;  %v1548_v9 = vmul.f32 %v1547_v63, %v2799_v20 }
0x1522   :  { %v2343_v0 = vpop.eup %2342 }
0x1523   :  { %v1668_v1 = vsel %vm2485_vm7, %v2341_v38, %v2343_v0 }
0x1524   :  { %1674 = vrot.lane.b32.xlu1 %v1668_v1, %s2366_s18  ;;  %v1672_v15 = vmul.f32 %v1670_v14, %v1668_v1 }
0x158c   :  { %v1551_v2 = vpop.permute.xlu0 %1550 }
0x158d   :  { %v1553_v5 = vmul.f32 %v1551_v2, %v1547_v63 }
0x158f   :  { %1555 = vrot.lane.b32.xlu0 %v1553_v5, %s2367_s21  ;;  %v1913_v5 = vld [vmem:[%s2931_s2 + $0x2] ss:$0 sm:$0xff] }
0x1596   :  { %v1675_v7 = vpop.permute.xlu1 %1674 }
0x1597   :  { %v1677_v8 = vmul.f32 %v1675_v7, %v1668_v1 }
0x1599   :  { %1679 = vrot.lane.b32.xlu1 %v1677_v8, %s2367_s21 }
0x1601   :  { %v1556_v11 = vpop.permute.xlu0 %1555 }
0x1602   :  { %v1558_v13 = vadd.f32 %v1556_v11, %v1548_v9 }
0x1604   :  { %2344 = vtanh.f32 %v1558_v13 }
0x160b   :  { %v1680_v16 = vpop.permute.xlu1 %1679 }
0x160c   :  { %v2843_v17 = vadd.f32 %v1680_v16, %v1672_v15 }
0x160e   :  { %2346 = vtanh.f32 %v2843_v17 }
0x1611   :  { %v2345_v18 = vpop.eup %2344 }
0x1612   :  { %1561 = vrot.lane.b32.xlu0 %v2345_v18, %s2366_s18 }
0x161b   :  { %v2347_v19 = vpop.eup %2346 }
0x161c   :  { %1685 = vrot.lane.b32.xlu1 %v2347_v19, %s2366_s18 }
0x1684   :  { %v1562_v21 = vpop.permute.xlu0 %1561 }
0x1685   :  { %v1564_v22 = vmul.f32 %v1562_v21, %v1547_v63 }
0x1687   :  { %v1570_v20 = vpack.c.bf16 %v1564_v22, %v1564_v22 }
0x1689   :  { %1572 = vrot.lane.b32.xlu0 %v1570_v20, %s2367_s21 }
0x168e   :  { %v1686_v24 = vpop.permute.xlu1 %1685 }
0x168f   :  { %v1688_v25 = vmul.f32 %v1686_v24, %v1668_v1 }
0x1691   :  { %v1689_v26 = vpack.c.bf16 %v1688_v25, %v1688_v25 }
0x1693   :  { %v1691_v29 = vrot.slane %v1689_v26, 3 }
0x1695   :  { %1692 = vrot.lane.b32.xlu1 %v1691_v29, %s2367_s21 }
0x16fb   :  { %v1573_v33 = vpop.permute.xlu0 %1572 }
0x16fc   :  { %2182 = vmatmul.mubr.msk.bf16.vlgmr.msra.gmra.mxu1 %vm161_vm1, %v1573_v33 }
0x16fd   :  { %2194 = vmatpush3.bf16.msra.mxu1 %v2360_v32  ;;  %2197 = vmatprep.mubr.msk.bf16.mxu1 %vm2365_vm0, %v2364_v3 }
0x16fe   :  { %2195 = vmatprep.subr.bf16.mxu1 %v2364_v3 }
0x1701   :  { %2196 = vmatpush3.bf16.msra.mxu1 %v2361_v23 }
0x1707   :  { %v1693_v36 = vpop.permute.xlu1 %1692 }
0x1708   :  { %2198 = vmatmul.mubr.msk.bf16.vlgmr.msra.gmra.mxu1 %vm161_vm1, %v1693_v36 }
0x17bc   :  { %v1611_v28 = vpop.f32.mrf.mxu1 }
0x17bd   :  { %v1612_v54 = vadd.f32 %v2362_v53, %v1611_v28 }
0x17be   :  { %v2183_v31 = vpop.f32.mrf.mxu1 }
0x17c0   :  { %v1614_v34 = vpop.f32.mrf.mxu1 }
0x17c2   :  { %v2184_v44 = vpop.f32.mrf.mxu1 }
0x17c8   :  { %v1731_v40 = vpop.f32.mrf.mxu1 }
0x17c9   :  { %v1737_v10 = vadd.f32 %v1731_v40, %v1612_v54 }
0x17ca   :  { %v2199_v35 = vpop.f32.mrf.mxu1 }
0x17cb   :  { %v1912_v46 = vmul.f32 -1.442695, %v1737_v10 }
0x17cc   :  { %v1734_v47 = vpop.f32.mrf.mxu1 }
0x17cd   :  { %2348 = vpow2.f32 %v1912_v46 }
0x17ce   :  { %v2200_v48 = vpop.f32.mrf.mxu1  ;;  %2350 = vtanh.f32 %v1737_v10 }
0x17da   :  { %v2349_v12 = vpop.eup %2348 }
0x17db   :  { %v1741_v49 = vadd.f32 1.0, %v2349_v12  ;;  %v2351_v37 = vpop.eup %2350 }
0x17dd   :  { %2352 = vrcp.f32 %v1741_v49 }
0x17ea   :  { %v2353_v50 = vpop.eup %2352 }
0x17eb   :  { %v1745_v51 = vsel %vm2485_vm7, %v2351_v37, %v2353_v50 }
0x17ec   :  { %1748 = vrot.lane.b32.xlu0 %v1745_v51, %s2366_s18  ;;  %v1746_v42 = vmul.f32 %v1745_v51, %v1558_v13 }
0x185e   :  { %v1749_v52 = vpop.permute.xlu0 %1748 }
0x185f   :  { %v1751_v4 = vmul.f32 %v1749_v52, %v1745_v51 }
0x1861   :  { %1753 = vrot.lane.b32.xlu1 %v1751_v4, %s2367_s21 }
0x1865   :  { %381 = vrot.lane.b32.xlu1 %v2559_v45, %s2367_s21 }
0x1869   :  { %778 = vrot.lane.b32.xlu1 %v2653_v41, %s2367_s21 }
0x186d   :  { %1170 = vrot.lane.b32.xlu1 %v2747_v27, %s2367_s21 }
0x1871   :  { %1566 = vrot.lane.b32.xlu1 %v1564_v22, %s2367_s21 }
0x1875   :  { %1769 = vrot.lane.b32.xlu1 %v1688_v25, %s2367_s21 }
0x18d3   :  { %v1754_v55 = vpop.permute.xlu1 %1753 }
0x18d4   :  { %v1756_v56 = vadd.f32 %v1754_v55, %v1746_v42 }
0x18d6   :  { %2354 = vtanh.f32 %v1756_v56  ;;  %1781 = vrot.lane.b32.xlu1 %v1756_v56, %s2368_s17 }
0x18d7   :  { %v382_v57 = vpop.permute.xlu1 %381 }
0x18d8   :  { %385 = vst.msk [vmem:[#allocation2] sm:$0x3] %vm384_vm8, %v382_v57 }
0x18db   :  { %v779_v45 = vpop.permute.xlu1 %778 }
0x18dc   :  { %781 = vst.msk [vmem:[#allocation2 + $0x4] sm:$0x3] %vm384_vm8, %v779_v45 }
0x18df   :  { %v1171_v41 = vpop.permute.xlu1 %1170 }
0x18e0   :  { %1173 = vst.msk [vmem:[#allocation2 + $0x8] sm:$0x3] %vm384_vm8, %v1171_v41 }
0x18e3   :  { %v2355_v27 = vpop.eup %2354  ;;  %v1567_v58 = vpop.permute.xlu1 %1566 }
0x18e4   :  { %1569 = vst.msk [vmem:[#allocation2 + $0xc] sm:$0x3] %vm384_vm8, %v1567_v58  ;;  %1759 = vrot.lane.b32.xlu0 %v2355_v27, %s2366_s18 }
0x18e7   :  { %v1770_v6 = vpop.permute.xlu1 %1769 }
0x18e8   :  { %1773 = vst.msk [vmem:[%s2932_s5 - $0x6] sm:$0xc0] %vm1772_vm9, %v1770_v6  ;;  %580 = vrot.lane.b32.xlu0 %v2606_v43, %s2367_s21  ;;  %v2227_v43 = vld [vmem:[%s2929_s1 + $0x50] sm:$0xff]  }
0x18e9   :  { %2204 = vmatpush3.bf16.msra.mxu0 %v2227_v43 }
0x18ec   :  { %976 = vrot.lane.b32.xlu0 %v2700_v39, %s2367_s21 }
0x18f0   :  { %1368 = vrot.lane.b32.xlu0 %v2808_v30, %s2367_s21 }
0x1948   :  { %v1782_v60 = vpop.permute.xlu1 %1781 }
0x1949   :  { %1784 = vst.msk [vmem:[%s2932_s5 + $0x6] sm:$0x3] %vm384_vm8, %v1782_v60 }
0x1956   :  { %v1760_v39 = vpop.permute.xlu0 %1759 }
0x1957   :  { %v1762_v30 = vmul.f32 %v1760_v39, %v1745_v51 }
0x1959   :  { %1764 = vrot.lane.b32.xlu0 %v1762_v30, %s2367_s21 }
0x195a   :  { %v581_v61 = vpop.permute.xlu0 %580 }
0x195b   :  { %583 = vst.msk [vmem:[#allocation2 + $0x2] sm:$0x3] %vm384_vm8, %v581_v61 }
0x195d   :  { %1776 = vrot.lane.b32.xlu0 %v2843_v17, %s2368_s17 }
0x195e   :  { %v977_v62 = vpop.permute.xlu0 %976 }
0x195f   :  { %979 = vst.msk [vmem:[#allocation2 + $0x6] sm:$0x3] %vm384_vm8, %v977_v62 }
0x1962   :  { %v1369_v63 = vpop.permute.xlu0 %1368 }
0x1963   :  { %1371 = vst.msk [vmem:[#allocation2 + $0xa] sm:$0x3] %vm384_vm8, %v1369_v63 }
0x1966   :  { %v1785_v0 = vld [vmem:[#allocation2] sm:$0xff] }
0x19cb   :  { %v1765_v3 = vpop.permute.xlu0 %1764 }
0x19cc   :  { %1767 = vst.msk [vmem:[#allocation2 + $0xe] sm:$0x3] %vm384_vm8, %v1765_v3  ;;  %1774 = vst.msk [vmem:[%s2932_s5 + $0x2] sm:$0x3] %vm384_vm8, %v1765_v3 }
0x19cf   :  { %v1777_v38 = vpop.permute.xlu0 %1776 }
0x19d0   :  { %1779 = vst.msk [vmem:[%s2932_s5 - $0x2] sm:$0xc0] %vm1772_vm9, %v1777_v38 }
0x19d3   :  { %v1786_v1 = vld [vmem:[#allocation2 + $0x8] sm:$0xff] }
0x19d4   :  { %v1787_v2 = vpack.c.bf16 %v1786_v1, %v1785_v0 }
0x19d6   :  { %2206 = vmatmul.mubr.msk.bf16.vlgmr.msra.gmra.mxu0 %vm161_vm1, %v1787_v2 }
0x1a96   :  { %v1841_v7 = vpop.f32.mrf.mxu0 }
0x1a97   :  { %v1842_v8 = vadd.f32 %v1913_v5, %v1841_v7 }
0x1a98   :  { %v2207_v9 = vpop.f32.mrf.mxu0 }
0x1a99   :  { %1848 = vst [vmem:[%s2933_s4] sm:$0xff] %v1842_v8 }
0x1a9a   :  { %v1844_v11 = vpop.f32.mrf.mxu0 }
0x1a9b   :  { %v1845_v13 = vadd.f32 %v1913_v5, %v1844_v11 }
0x1a9c   :  { %v2208_v14 = vpop.f32.mrf.mxu0 }
0x1a9d   :  { %1849 = vst [vmem:[%s2933_s4 + $0x8] sm:$0xff] %v1845_v13 }

</bundles_post_ra>
